<compile_context>
chip_gen: v5e
topology: v5e:2x2
jax: 0.10.0
libtpu: 0.0.40
codegen_flags: <defaults>
</compile_context>

<pallas_src>
import functools

import jax
import jax.numpy as jnp
from jax.experimental import pallas as pl
from jax.experimental.pallas import tpu as pltpu


def _spatial_attention_kernel(w_ref, x_ref, o_ref, pad_ref, *, C, H, W, KH, KW, PAD):
    # w_ref  : SMEM (2*KH*KW,)        conv1 weight (OC==1), flattened [cin, kh, kw]
    # x_ref  : VMEM (1, C, H, W)      one batch element
    # o_ref  : VMEM (1, 1, H, W)
    # pad_ref: VMEM (2, H+2P, W+2P)   zero-padded [avg; max] maps (scratch)

    # --- channel reduction (mean / max over C): elementwise across vregs (VPU) ---
    x = x_ref[0].astype(jnp.float32)          # (C, H, W)
    avg = jnp.mean(x, axis=0)                 # (H, W)
    mx = jnp.max(x, axis=0)                   # (H, W)

    # --- build zero-padded maps in VMEM scratch.
    # Re-zero every step: with a megacore-parallel grid each core owns its own
    # scratch, so we cannot rely on a program_id==0 one-time init. The buffer is
    # tiny (2*(H+2P)*(W+2P) floats).
    pad_ref[...] = jnp.zeros_like(pad_ref)
    pad_ref[0, PAD:PAD + H, PAD:PAD + W] = avg
    pad_ref[1, PAD:PAD + H, PAD:PAD + W] = mx

    # --- direct cross-correlation: fully unrolled shifted MACs.
    # Load each (H, W+2P) row-band once per (c, kh); per-kw shifts are static
    # value slices (lane rotations) so the VMEM load slots stay nearly idle.
    acc = jnp.zeros((H, W), jnp.float32)
    for c in range(2):
        for kh in range(KH):
            band = pad_ref[c, kh:kh + H, :]                  # (H, W+2P), one load
            for kw in range(KW):
                w = w_ref[c * KH * KW + kh * KW + kw]        # scalar from SMEM
                acc = acc + w * band[:, kw:kw + W]           # lane-shift + MAC

    # --- sigmoid (exp runs on the EUP slot), write output once ---
    o_ref[0, 0] = (1.0 / (1.0 + jnp.exp(-acc))).astype(o_ref.dtype)


def spatial_attention(x, weight):
    """SpatialAttention forward: sigmoid(conv2d(cat[mean_c(x), max_c(x)], w)).

    x:      (N, C, H, W) float32
    weight: (1, 2, KH, KW) conv1 weight (bias=False), KH == KW in (3, 7)
    returns (N, 1, H, W) float32 attention map
    """
    N, C, H, W = x.shape
    OC, IC, KH, KW = weight.shape
    assert OC == 1 and IC == 2 and KH == KW and KH in (3, 7)
    PAD = (KH - 1) // 2

    w_flat = weight.reshape(-1).astype(jnp.float32)   # (2*KH*KW,) -> SMEM

    kernel = functools.partial(
        _spatial_attention_kernel, C=C, H=H, W=W, KH=KH, KW=KW, PAD=PAD)

    out_bytes = N * H * W * 4
    cost = pl.CostEstimate(
        flops=N * H * W * (2 * 2 * KH * KW + 2 * C),   # conv MACs + mean/max
        transcendentals=N * H * W,                     # sigmoid exp
        bytes_accessed=x.size * x.dtype.itemsize + w_flat.size * 4 + out_bytes,
    )

    return pl.pallas_call(
        kernel,
        out_shape=jax.ShapeDtypeStruct((N, 1, H, W), jnp.float32),
        grid_spec=pltpu.PrefetchScalarGridSpec(
            num_scalar_prefetch=0,
            grid=(N,),                                              # one batch elem / step
            in_specs=[
                pl.BlockSpec(memory_space=pltpu.MemorySpace.SMEM),      # weights
                pl.BlockSpec((1, C, H, W), lambda n: (n, 0, 0, 0)),     # x tile
            ],
            out_specs=pl.BlockSpec((1, 1, H, W), lambda n: (n, 0, 0, 0)),
            scratch_shapes=[
                pltpu.VMEM((2, H + 2 * PAD, W + 2 * PAD), jnp.float32),
            ],
        ),
        compiler_params=pltpu.CompilerParams(
            dimension_semantics=("parallel",)),        # shard batch across v7x's 2 TCs
        cost_estimate=cost,
    )(w_flat, x)


def reference(x, weight):
    avg = jnp.mean(x, axis=1, keepdims=True)
    mx = jnp.max(x, axis=1, keepdims=True)
    xc = jnp.concatenate([avg, mx], axis=1)
    pad = (weight.shape[-1] - 1) // 2
    y = jax.lax.conv_general_dilated(
        xc, weight, window_strides=(1, 1),
        padding=((pad, pad), (pad, pad)),
        dimension_numbers=("NCHW", "OIHW", "NCHW"))
    return jax.nn.sigmoid(y)


if __name__ == "__main__":
    key = jax.random.PRNGKey(0)
    k1, k2 = jax.random.split(key)

    # SpatialAttention(kernel_size=7) on a small NCHW input
    N, C, H, W = 2, 4, 16, 16
    KH = KW = 7

    x = jax.random.normal(k1, (N, C, H, W), dtype=jnp.float32)
    weight = jax.random.normal(k2, (1, 2, KH, KW), dtype=jnp.float32) * 0.1

    out = spatial_attention(x, weight)
    out = jax.block_until_ready(out)

    ref = reference(x, weight)
    assert out.shape == (N, 1, H, W)
    assert jnp.allclose(out, ref, atol=1e-4, rtol=1e-4), float(jnp.max(jnp.abs(out - ref)))
    print("KERNEL_OK")
</pallas_src>

<mosaic_0001>
module attributes {stable_mosaic.version = 11 : i64} {
  func.func @_spatial_attention_kernel(%arg0: i32, %arg1: memref<98xf32, #tpu.memory_space<smem>>, %arg2: memref<1x4x16x16xf32, #tpu.memory_space<vmem>>, %arg3: memref<1x1x16x16xf32, #tpu.memory_space<vmem>>, %arg4: memref<2x22x22xf32, #tpu.memory_space<vmem>>) attributes {dimension_semantics = [#tpu.dimension_semantics<parallel>], iteration_bounds = array<i64: 2>, scalar_prefetch = 0 : i64, scratch_operands = 1 : i64, tpu.core_type = #tpu.core_type<tc>, window_params = [{transform_indices = @transform_0, window_bounds = array<i64: 98>}, {transform_indices = @transform_1, window_bounds = array<i64: 1, 4, 16, 16>}, {transform_indices = @transform_2, window_bounds = array<i64: 1, 1, 16, 16>}]} {
    %c0 = arith.constant 0 : index
    %c0_0 = arith.constant 0 : index
    %c0_1 = arith.constant 0 : index
    %c0_2 = arith.constant 0 : index
    %0 = vector.load %arg2[%c0, %c0_0, %c0_1, %c0_2] : memref<1x4x16x16xf32, #tpu.memory_space<vmem>>, vector<1x4x16x16xf32>
    %1 = vector.shape_cast %0 : vector<1x4x16x16xf32> to vector<4x16x16xf32>
    %cst = arith.constant dense<0.000000e+00> : vector<16x16xf32>
    %2 = vector.multi_reduction <add>, %1, %cst [0] : vector<4x16x16xf32> to vector<16x16xf32>
    %cst_3 = arith.constant 4.000000e+00 : f32
    %3 = vector.broadcast %cst_3 : f32 to vector<16x16xf32>
    %4 = arith.divf %2, %3 : vector<16x16xf32>
    %cst_4 = arith.constant dense<0xFF800000> : vector<16x16xf32>
    %5 = vector.multi_reduction <maximumf>, %1, %cst_4 [0] : vector<4x16x16xf32> to vector<16x16xf32>
    %cst_5 = arith.constant 0.000000e+00 : f32
    %6 = vector.broadcast %cst_5 : f32 to vector<2x22x22xf32>
    %c0_6 = arith.constant 0 : index
    %c0_7 = arith.constant 0 : index
    %c0_8 = arith.constant 0 : index
    %7 = vector.load %arg4[%c0_6, %c0_7, %c0_8] : memref<2x22x22xf32, #tpu.memory_space<vmem>>, vector<2x22x22xf32>
    tpu.vector_store %arg4[%c0_6, %c0_7, %c0_8], %6 {strides = array<i32>} : memref<2x22x22xf32, #tpu.memory_space<vmem>>, vector<2x22x22xf32>,
    %c0_9 = arith.constant 0 : index
    %c3 = arith.constant 3 : index
    %c3_10 = arith.constant 3 : index
    %8 = vector.load %arg4[%c0_9, %c3, %c3_10] : memref<2x22x22xf32, #tpu.memory_space<vmem>>, vector<1x16x16xf32>
    %9 = vector.shape_cast %8 : vector<1x16x16xf32> to vector<16x16xf32>
    %10 = vector.shape_cast %4 : vector<16x16xf32> to vector<1x16x16xf32>
    tpu.vector_store %arg4[%c0_9, %c3, %c3_10], %10 {strides = array<i32>} : memref<2x22x22xf32, #tpu.memory_space<vmem>>, vector<1x16x16xf32>,
    %c1 = arith.constant 1 : index
    %c3_11 = arith.constant 3 : index
    %c3_12 = arith.constant 3 : index
    %11 = vector.load %arg4[%c1, %c3_11, %c3_12] : memref<2x22x22xf32, #tpu.memory_space<vmem>>, vector<1x16x16xf32>
    %12 = vector.shape_cast %11 : vector<1x16x16xf32> to vector<16x16xf32>
    %13 = vector.shape_cast %5 : vector<16x16xf32> to vector<1x16x16xf32>
    tpu.vector_store %arg4[%c1, %c3_11, %c3_12], %13 {strides = array<i32>} : memref<2x22x22xf32, #tpu.memory_space<vmem>>, vector<1x16x16xf32>,
    %cst_13 = arith.constant 0.000000e+00 : f32
    %14 = vector.broadcast %cst_13 : f32 to vector<16x16xf32>
    %c0_14 = arith.constant 0 : index
    %c0_15 = arith.constant 0 : index
    %c0_16 = arith.constant 0 : index
    %15 = vector.load %arg4[%c0_14, %c0_15, %c0_16] : memref<2x22x22xf32, #tpu.memory_space<vmem>>, vector<1x16x22xf32>
    %16 = vector.shape_cast %15 : vector<1x16x22xf32> to vector<16x22xf32>
    %c0_17 = arith.constant 0 : index
    %17 = memref.load %arg1[%c0_17] : memref<98xf32, #tpu.memory_space<smem>>
    %18 = vector.extract_strided_slice %16 {offsets = [0, 0], sizes = [16, 16], strides = [1, 1]} : vector<16x22xf32> to vector<16x16xf32>
    %19 = vector.broadcast %17 : f32 to vector<16x16xf32>
    %20 = arith.mulf %19, %18 : vector<16x16xf32>
    %21 = arith.addf %14, %20 : vector<16x16xf32>
    %c1_18 = arith.constant 1 : index
    %22 = memref.load %arg1[%c1_18] : memref<98xf32, #tpu.memory_space<smem>>
    %23 = vector.extract_strided_slice %16 {offsets = [0, 1], sizes = [16, 16], strides = [1, 1]} : vector<16x22xf32> to vector<16x16xf32>
    %24 = vector.broadcast %22 : f32 to vector<16x16xf32>
    %25 = arith.mulf %24, %23 : vector<16x16xf32>
    %26 = arith.addf %21, %25 : vector<16x16xf32>
    %c2 = arith.constant 2 : index
    %27 = memref.load %arg1[%c2] : memref<98xf32, #tpu.memory_space<smem>>
    %28 = vector.extract_strided_slice %16 {offsets = [0, 2], sizes = [16, 16], strides = [1, 1]} : vector<16x22xf32> to vector<16x16xf32>
    %29 = vector.broadcast %27 : f32 to vector<16x16xf32>
    %30 = arith.mulf %29, %28 : vector<16x16xf32>
    %31 = arith.addf %26, %30 : vector<16x16xf32>
    %c3_19 = arith.constant 3 : index
    %32 = memref.load %arg1[%c3_19] : memref<98xf32, #tpu.memory_space<smem>>
    %33 = vector.extract_strided_slice %16 {offsets = [0, 3], sizes = [16, 16], strides = [1, 1]} : vector<16x22xf32> to vector<16x16xf32>
    %34 = vector.broadcast %32 : f32 to vector<16x16xf32>
    %35 = arith.mulf %34, %33 : vector<16x16xf32>
    %36 = arith.addf %31, %35 : vector<16x16xf32>
    %c4 = arith.constant 4 : index
    %37 = memref.load %arg1[%c4] : memref<98xf32, #tpu.memory_space<smem>>
    %38 = vector.extract_strided_slice %16 {offsets = [0, 4], sizes = [16, 16], strides = [1, 1]} : vector<16x22xf32> to vector<16x16xf32>
    %39 = vector.broadcast %37 : f32 to vector<16x16xf32>
    %40 = arith.mulf %39, %38 : vector<16x16xf32>
    %41 = arith.addf %36, %40 : vector<16x16xf32>
    %c5 = arith.constant 5 : index
    %42 = memref.load %arg1[%c5] : memref<98xf32, #tpu.memory_space<smem>>
    %43 = vector.extract_strided_slice %16 {offsets = [0, 5], sizes = [16, 16], strides = [1, 1]} : vector<16x22xf32> to vector<16x16xf32>
    %44 = vector.broadcast %42 : f32 to vector<16x16xf32>
    %45 = arith.mulf %44, %43 : vector<16x16xf32>
    %46 = arith.addf %41, %45 : vector<16x16xf32>
    %c6 = arith.constant 6 : index
    %47 = memref.load %arg1[%c6] : memref<98xf32, #tpu.memory_space<smem>>
    %48 = vector.extract_strided_slice %16 {offsets = [0, 6], sizes = [16, 16], strides = [1, 1]} : vector<16x22xf32> to vector<16x16xf32>
    %49 = vector.broadcast %47 : f32 to vector<16x16xf32>
    %50 = arith.mulf %49, %48 : vector<16x16xf32>
    %51 = arith.addf %46, %50 : vector<16x16xf32>
    %c0_20 = arith.constant 0 : index
    %c1_21 = arith.constant 1 : index
    %c0_22 = arith.constant 0 : index
    %52 = vector.load %arg4[%c0_20, %c1_21, %c0_22] : memref<2x22x22xf32, #tpu.memory_space<vmem>>, vector<1x16x22xf32>
    %53 = vector.shape_cast %52 : vector<1x16x22xf32> to vector<16x22xf32>
    %c7 = arith.constant 7 : index
    %54 = memref.load %arg1[%c7] : memref<98xf32, #tpu.memory_space<smem>>
    %55 = vector.extract_strided_slice %53 {offsets = [0, 0], sizes = [16, 16], strides = [1, 1]} : vector<16x22xf32> to vector<16x16xf32>
    %56 = vector.broadcast %54 : f32 to vector<16x16xf32>
    %57 = arith.mulf %56, %55 : vector<16x16xf32>
    %58 = arith.addf %51, %57 : vector<16x16xf32>
    %c8 = arith.constant 8 : index
    %59 = memref.load %arg1[%c8] : memref<98xf32, #tpu.memory_space<smem>>
    %60 = vector.extract_strided_slice %53 {offsets = [0, 1], sizes = [16, 16], strides = [1, 1]} : vector<16x22xf32> to vector<16x16xf32>
    %61 = vector.broadcast %59 : f32 to vector<16x16xf32>
    %62 = arith.mulf %61, %60 : vector<16x16xf32>
    %63 = arith.addf %58, %62 : vector<16x16xf32>
    %c9 = arith.constant 9 : index
    %64 = memref.load %arg1[%c9] : memref<98xf32, #tpu.memory_space<smem>>
    %65 = vector.extract_strided_slice %53 {offsets = [0, 2], sizes = [16, 16], strides = [1, 1]} : vector<16x22xf32> to vector<16x16xf32>
    %66 = vector.broadcast %64 : f32 to vector<16x16xf32>
    %67 = arith.mulf %66, %65 : vector<16x16xf32>
    %68 = arith.addf %63, %67 : vector<16x16xf32>
    %c10 = arith.constant 10 : index
    %69 = memref.load %arg1[%c10] : memref<98xf32, #tpu.memory_space<smem>>
    %70 = vector.extract_strided_slice %53 {offsets = [0, 3], sizes = [16, 16], strides = [1, 1]} : vector<16x22xf32> to vector<16x16xf32>
    %71 = vector.broadcast %69 : f32 to vector<16x16xf32>
    %72 = arith.mulf %71, %70 : vector<16x16xf32>
    %73 = arith.addf %68, %72 : vector<16x16xf32>
    %c11 = arith.constant 11 : index
    %74 = memref.load %arg1[%c11] : memref<98xf32, #tpu.memory_space<smem>>
    %75 = vector.extract_strided_slice %53 {offsets = [0, 4], sizes = [16, 16], strides = [1, 1]} : vector<16x22xf32> to vector<16x16xf32>
    %76 = vector.broadcast %74 : f32 to vector<16x16xf32>
    %77 = arith.mulf %76, %75 : vector<16x16xf32>
    %78 = arith.addf %73, %77 : vector<16x16xf32>
    %c12 = arith.constant 12 : index
    %79 = memref.load %arg1[%c12] : memref<98xf32, #tpu.memory_space<smem>>
    %80 = vector.extract_strided_slice %53 {offsets = [0, 5], sizes = [16, 16], strides = [1, 1]} : vector<16x22xf32> to vector<16x16xf32>
    %81 = vector.broadcast %79 : f32 to vector<16x16xf32>
    %82 = arith.mulf %81, %80 : vector<16x16xf32>
    %83 = arith.addf %78, %82 : vector<16x16xf32>
    %c13 = arith.constant 13 : index
    %84 = memref.load %arg1[%c13] : memref<98xf32, #tpu.memory_space<smem>>
    %85 = vector.extract_strided_slice %53 {offsets = [0, 6], sizes = [16, 16], strides = [1, 1]} : vector<16x22xf32> to vector<16x16xf32>
    %86 = vector.broadcast %84 : f32 to vector<16x16xf32>
    %87 = arith.mulf %86, %85 : vector<16x16xf32>
    %88 = arith.addf %83, %87 : vector<16x16xf32>
    %c0_23 = arith.constant 0 : index
    %c2_24 = arith.constant 2 : index
    %c0_25 = arith.constant 0 : index
    %89 = vector.load %arg4[%c0_23, %c2_24, %c0_25] : memref<2x22x22xf32, #tpu.memory_space<vmem>>, vector<1x16x22xf32>
    %90 = vector.shape_cast %89 : vector<1x16x22xf32> to vector<16x22xf32>
    %c14 = arith.constant 14 : index
    %91 = memref.load %arg1[%c14] : memref<98xf32, #tpu.memory_space<smem>>
    %92 = vector.extract_strided_slice %90 {offsets = [0, 0], sizes = [16, 16], strides = [1, 1]} : vector<16x22xf32> to vector<16x16xf32>
    %93 = vector.broadcast %91 : f32 to vector<16x16xf32>
    %94 = arith.mulf %93, %92 : vector<16x16xf32>
    %95 = arith.addf %88, %94 : vector<16x16xf32>
    %c15 = arith.constant 15 : index
    %96 = memref.load %arg1[%c15] : memref<98xf32, #tpu.memory_space<smem>>
    %97 = vector.extract_strided_slice %90 {offsets = [0, 1], sizes = [16, 16], strides = [1, 1]} : vector<16x22xf32> to vector<16x16xf32>
    %98 = vector.broadcast %96 : f32 to vector<16x16xf32>
    %99 = arith.mulf %98, %97 : vector<16x16xf32>
    %100 = arith.addf %95, %99 : vector<16x16xf32>
    %c16 = arith.constant 16 : index
    %101 = memref.load %arg1[%c16] : memref<98xf32, #tpu.memory_space<smem>>
    %102 = vector.extract_strided_slice %90 {offsets = [0, 2], sizes = [16, 16], strides = [1, 1]} : vector<16x22xf32> to vector<16x16xf32>
    %103 = vector.broadcast %101 : f32 to vector<16x16xf32>
    %104 = arith.mulf %103, %102 : vector<16x16xf32>
    %105 = arith.addf %100, %104 : vector<16x16xf32>
    %c17 = arith.constant 17 : index
    %106 = memref.load %arg1[%c17] : memref<98xf32, #tpu.memory_space<smem>>
    %107 = vector.extract_strided_slice %90 {offsets = [0, 3], sizes = [16, 16], strides = [1, 1]} : vector<16x22xf32> to vector<16x16xf32>
    %108 = vector.broadcast %106 : f32 to vector<16x16xf32>
    %109 = arith.mulf %108, %107 : vector<16x16xf32>
    %110 = arith.addf %105, %109 : vector<16x16xf32>
    %c18 = arith.constant 18 : index
    %111 = memref.load %arg1[%c18] : memref<98xf32, #tpu.memory_space<smem>>
    %112 = vector.extract_strided_slice %90 {offsets = [0, 4], sizes = [16, 16], strides = [1, 1]} : vector<16x22xf32> to vector<16x16xf32>
    %113 = vector.broadcast %111 : f32 to vector<16x16xf32>
    %114 = arith.mulf %113, %112 : vector<16x16xf32>
    %115 = arith.addf %110, %114 : vector<16x16xf32>
    %c19 = arith.constant 19 : index
    %116 = memref.load %arg1[%c19] : memref<98xf32, #tpu.memory_space<smem>>
    %117 = vector.extract_strided_slice %90 {offsets = [0, 5], sizes = [16, 16], strides = [1, 1]} : vector<16x22xf32> to vector<16x16xf32>
    %118 = vector.broadcast %116 : f32 to vector<16x16xf32>
    %119 = arith.mulf %118, %117 : vector<16x16xf32>
    %120 = arith.addf %115, %119 : vector<16x16xf32>
    %c20 = arith.constant 20 : index
    %121 = memref.load %arg1[%c20] : memref<98xf32, #tpu.memory_space<smem>>
    %122 = vector.extract_strided_slice %90 {offsets = [0, 6], sizes = [16, 16], strides = [1, 1]} : vector<16x22xf32> to vector<16x16xf32>
    %123 = vector.broadcast %121 : f32 to vector<16x16xf32>
    %124 = arith.mulf %123, %122 : vector<16x16xf32>
    %125 = arith.addf %120, %124 : vector<16x16xf32>
    %c0_26 = arith.constant 0 : index
    %c3_27 = arith.constant 3 : index
    %c0_28 = arith.constant 0 : index
    %126 = vector.load %arg4[%c0_26, %c3_27, %c0_28] : memref<2x22x22xf32, #tpu.memory_space<vmem>>, vector<1x16x22xf32>
    %127 = vector.shape_cast %126 : vector<1x16x22xf32> to vector<16x22xf32>
    %c21 = arith.constant 21 : index
    %128 = memref.load %arg1[%c21] : memref<98xf32, #tpu.memory_space<smem>>
    %129 = vector.extract_strided_slice %127 {offsets = [0, 0], sizes = [16, 16], strides = [1, 1]} : vector<16x22xf32> to vector<16x16xf32>
    %130 = vector.broadcast %128 : f32 to vector<16x16xf32>
    %131 = arith.mulf %130, %129 : vector<16x16xf32>
    %132 = arith.addf %125, %131 : vector<16x16xf32>
    %c22 = arith.constant 22 : index
    %133 = memref.load %arg1[%c22] : memref<98xf32, #tpu.memory_space<smem>>
    %134 = vector.extract_strided_slice %127 {offsets = [0, 1], sizes = [16, 16], strides = [1, 1]} : vector<16x22xf32> to vector<16x16xf32>
    %135 = vector.broadcast %133 : f32 to vector<16x16xf32>
    %136 = arith.mulf %135, %134 : vector<16x16xf32>
    %137 = arith.addf %132, %136 : vector<16x16xf32>
    %c23 = arith.constant 23 : index
    %138 = memref.load %arg1[%c23] : memref<98xf32, #tpu.memory_space<smem>>
    %139 = vector.extract_strided_slice %127 {offsets = [0, 2], sizes = [16, 16], strides = [1, 1]} : vector<16x22xf32> to vector<16x16xf32>
    %140 = vector.broadcast %138 : f32 to vector<16x16xf32>
    %141 = arith.mulf %140, %139 : vector<16x16xf32>
    %142 = arith.addf %137, %141 : vector<16x16xf32>
    %c24 = arith.constant 24 : index
    %143 = memref.load %arg1[%c24] : memref<98xf32, #tpu.memory_space<smem>>
    %144 = vector.extract_strided_slice %127 {offsets = [0, 3], sizes = [16, 16], strides = [1, 1]} : vector<16x22xf32> to vector<16x16xf32>
    %145 = vector.broadcast %143 : f32 to vector<16x16xf32>
    %146 = arith.mulf %145, %144 : vector<16x16xf32>
    %147 = arith.addf %142, %146 : vector<16x16xf32>
    %c25 = arith.constant 25 : index
    %148 = memref.load %arg1[%c25] : memref<98xf32, #tpu.memory_space<smem>>
    %149 = vector.extract_strided_slice %127 {offsets = [0, 4], sizes = [16, 16], strides = [1, 1]} : vector<16x22xf32> to vector<16x16xf32>
    %150 = vector.broadcast %148 : f32 to vector<16x16xf32>
    %151 = arith.mulf %150, %149 : vector<16x16xf32>
    %152 = arith.addf %147, %151 : vector<16x16xf32>
    %c26 = arith.constant 26 : index
    %153 = memref.load %arg1[%c26] : memref<98xf32, #tpu.memory_space<smem>>
    %154 = vector.extract_strided_slice %127 {offsets = [0, 5], sizes = [16, 16], strides = [1, 1]} : vector<16x22xf32> to vector<16x16xf32>
    %155 = vector.broadcast %153 : f32 to vector<16x16xf32>
    %156 = arith.mulf %155, %154 : vector<16x16xf32>
    %157 = arith.addf %152, %156 : vector<16x16xf32>
    %c27 = arith.constant 27 : index
    %158 = memref.load %arg1[%c27] : memref<98xf32, #tpu.memory_space<smem>>
    %159 = vector.extract_strided_slice %127 {offsets = [0, 6], sizes = [16, 16], strides = [1, 1]} : vector<16x22xf32> to vector<16x16xf32>
    %160 = vector.broadcast %158 : f32 to vector<16x16xf32>
    %161 = arith.mulf %160, %159 : vector<16x16xf32>
    %162 = arith.addf %157, %161 : vector<16x16xf32>
    %c0_29 = arith.constant 0 : index
    %c4_30 = arith.constant 4 : index
    %c0_31 = arith.constant 0 : index
    %163 = vector.load %arg4[%c0_29, %c4_30, %c0_31] : memref<2x22x22xf32, #tpu.memory_space<vmem>>, vector<1x16x22xf32>
    %164 = vector.shape_cast %163 : vector<1x16x22xf32> to vector<16x22xf32>
    %c28 = arith.constant 28 : index
    %165 = memref.load %arg1[%c28] : memref<98xf32, #tpu.memory_space<smem>>
    %166 = vector.extract_strided_slice %164 {offsets = [0, 0], sizes = [16, 16], strides = [1, 1]} : vector<16x22xf32> to vector<16x16xf32>
    %167 = vector.broadcast %165 : f32 to vector<16x16xf32>
    %168 = arith.mulf %167, %166 : vector<16x16xf32>
    %169 = arith.addf %162, %168 : vector<16x16xf32>
    %c29 = arith.constant 29 : index
    %170 = memref.load %arg1[%c29] : memref<98xf32, #tpu.memory_space<smem>>
    %171 = vector.extract_strided_slice %164 {offsets = [0, 1], sizes = [16, 16], strides = [1, 1]} : vector<16x22xf32> to vector<16x16xf32>
    %172 = vector.broadcast %170 : f32 to vector<16x16xf32>
    %173 = arith.mulf %172, %171 : vector<16x16xf32>
    %174 = arith.addf %169, %173 : vector<16x16xf32>
    %c30 = arith.constant 30 : index
    %175 = memref.load %arg1[%c30] : memref<98xf32, #tpu.memory_space<smem>>
    %176 = vector.extract_strided_slice %164 {offsets = [0, 2], sizes = [16, 16], strides = [1, 1]} : vector<16x22xf32> to vector<16x16xf32>
    %177 = vector.broadcast %175 : f32 to vector<16x16xf32>
    %178 = arith.mulf %177, %176 : vector<16x16xf32>
    %179 = arith.addf %174, %178 : vector<16x16xf32>
    %c31 = arith.constant 31 : index
    %180 = memref.load %arg1[%c31] : memref<98xf32, #tpu.memory_space<smem>>
    %181 = vector.extract_strided_slice %164 {offsets = [0, 3], sizes = [16, 16], strides = [1, 1]} : vector<16x22xf32> to vector<16x16xf32>
    %182 = vector.broadcast %180 : f32 to vector<16x16xf32>
    %183 = arith.mulf %182, %181 : vector<16x16xf32>
    %184 = arith.addf %179, %183 : vector<16x16xf32>
    %c32 = arith.constant 32 : index
    %185 = memref.load %arg1[%c32] : memref<98xf32, #tpu.memory_space<smem>>
    %186 = vector.extract_strided_slice %164 {offsets = [0, 4], sizes = [16, 16], strides = [1, 1]} : vector<16x22xf32> to vector<16x16xf32>
    %187 = vector.broadcast %185 : f32 to vector<16x16xf32>
    %188 = arith.mulf %187, %186 : vector<16x16xf32>
    %189 = arith.addf %184, %188 : vector<16x16xf32>
    %c33 = arith.constant 33 : index
    %190 = memref.load %arg1[%c33] : memref<98xf32, #tpu.memory_space<smem>>
    %191 = vector.extract_strided_slice %164 {offsets = [0, 5], sizes = [16, 16], strides = [1, 1]} : vector<16x22xf32> to vector<16x16xf32>
    %192 = vector.broadcast %190 : f32 to vector<16x16xf32>
    %193 = arith.mulf %192, %191 : vector<16x16xf32>
    %194 = arith.addf %189, %193 : vector<16x16xf32>
    %c34 = arith.constant 34 : index
    %195 = memref.load %arg1[%c34] : memref<98xf32, #tpu.memory_space<smem>>
    %196 = vector.extract_strided_slice %164 {offsets = [0, 6], sizes = [16, 16], strides = [1, 1]} : vector<16x22xf32> to vector<16x16xf32>
    %197 = vector.broadcast %195 : f32 to vector<16x16xf32>
    %198 = arith.mulf %197, %196 : vector<16x16xf32>
    %199 = arith.addf %194, %198 : vector<16x16xf32>
    %c0_32 = arith.constant 0 : index
    %c5_33 = arith.constant 5 : index
    %c0_34 = arith.constant 0 : index
    %200 = vector.load %arg4[%c0_32, %c5_33, %c0_34] : memref<2x22x22xf32, #tpu.memory_space<vmem>>, vector<1x16x22xf32>
    %201 = vector.shape_cast %200 : vector<1x16x22xf32> to vector<16x22xf32>
    %c35 = arith.constant 35 : index
    %202 = memref.load %arg1[%c35] : memref<98xf32, #tpu.memory_space<smem>>
    %203 = vector.extract_strided_slice %201 {offsets = [0, 0], sizes = [16, 16], strides = [1, 1]} : vector<16x22xf32> to vector<16x16xf32>
    %204 = vector.broadcast %202 : f32 to vector<16x16xf32>
    %205 = arith.mulf %204, %203 : vector<16x16xf32>
    %206 = arith.addf %199, %205 : vector<16x16xf32>
    %c36 = arith.constant 36 : index
    %207 = memref.load %arg1[%c36] : memref<98xf32, #tpu.memory_space<smem>>
    %208 = vector.extract_strided_slice %201 {offsets = [0, 1], sizes = [16, 16], strides = [1, 1]} : vector<16x22xf32> to vector<16x16xf32>
    %209 = vector.broadcast %207 : f32 to vector<16x16xf32>
    %210 = arith.mulf %209, %208 : vector<16x16xf32>
    %211 = arith.addf %206, %210 : vector<16x16xf32>
    %c37 = arith.constant 37 : index
    %212 = memref.load %arg1[%c37] : memref<98xf32, #tpu.memory_space<smem>>
    %213 = vector.extract_strided_slice %201 {offsets = [0, 2], sizes = [16, 16], strides = [1, 1]} : vector<16x22xf32> to vector<16x16xf32>
    %214 = vector.broadcast %212 : f32 to vector<16x16xf32>
    %215 = arith.mulf %214, %213 : vector<16x16xf32>
    %216 = arith.addf %211, %215 : vector<16x16xf32>
    %c38 = arith.constant 38 : index
    %217 = memref.load %arg1[%c38] : memref<98xf32, #tpu.memory_space<smem>>
    %218 = vector.extract_strided_slice %201 {offsets = [0, 3], sizes = [16, 16], strides = [1, 1]} : vector<16x22xf32> to vector<16x16xf32>
    %219 = vector.broadcast %217 : f32 to vector<16x16xf32>
    %220 = arith.mulf %219, %218 : vector<16x16xf32>
    %221 = arith.addf %216, %220 : vector<16x16xf32>
    %c39 = arith.constant 39 : index
    %222 = memref.load %arg1[%c39] : memref<98xf32, #tpu.memory_space<smem>>
    %223 = vector.extract_strided_slice %201 {offsets = [0, 4], sizes = [16, 16], strides = [1, 1]} : vector<16x22xf32> to vector<16x16xf32>
    %224 = vector.broadcast %222 : f32 to vector<16x16xf32>
    %225 = arith.mulf %224, %223 : vector<16x16xf32>
    %226 = arith.addf %221, %225 : vector<16x16xf32>
    %c40 = arith.constant 40 : index
    %227 = memref.load %arg1[%c40] : memref<98xf32, #tpu.memory_space<smem>>
    %228 = vector.extract_strided_slice %201 {offsets = [0, 5], sizes = [16, 16], strides = [1, 1]} : vector<16x22xf32> to vector<16x16xf32>
    %229 = vector.broadcast %227 : f32 to vector<16x16xf32>
    %230 = arith.mulf %229, %228 : vector<16x16xf32>
    %231 = arith.addf %226, %230 : vector<16x16xf32>
    %c41 = arith.constant 41 : index
    %232 = memref.load %arg1[%c41] : memref<98xf32, #tpu.memory_space<smem>>
    %233 = vector.extract_strided_slice %201 {offsets = [0, 6], sizes = [16, 16], strides = [1, 1]} : vector<16x22xf32> to vector<16x16xf32>
    %234 = vector.broadcast %232 : f32 to vector<16x16xf32>
    %235 = arith.mulf %234, %233 : vector<16x16xf32>
    %236 = arith.addf %231, %235 : vector<16x16xf32>
    %c0_35 = arith.constant 0 : index
    %c6_36 = arith.constant 6 : index
    %c0_37 = arith.constant 0 : index
    %237 = vector.load %arg4[%c0_35, %c6_36, %c0_37] : memref<2x22x22xf32, #tpu.memory_space<vmem>>, vector<1x16x22xf32>
    %238 = vector.shape_cast %237 : vector<1x16x22xf32> to vector<16x22xf32>
    %c42 = arith.constant 42 : index
    %239 = memref.load %arg1[%c42] : memref<98xf32, #tpu.memory_space<smem>>
    %240 = vector.extract_strided_slice %238 {offsets = [0, 0], sizes = [16, 16], strides = [1, 1]} : vector<16x22xf32> to vector<16x16xf32>
    %241 = vector.broadcast %239 : f32 to vector<16x16xf32>
    %242 = arith.mulf %241, %240 : vector<16x16xf32>
    %243 = arith.addf %236, %242 : vector<16x16xf32>
    %c43 = arith.constant 43 : index
    %244 = memref.load %arg1[%c43] : memref<98xf32, #tpu.memory_space<smem>>
    %245 = vector.extract_strided_slice %238 {offsets = [0, 1], sizes = [16, 16], strides = [1, 1]} : vector<16x22xf32> to vector<16x16xf32>
    %246 = vector.broadcast %244 : f32 to vector<16x16xf32>
    %247 = arith.mulf %246, %245 : vector<16x16xf32>
    %248 = arith.addf %243, %247 : vector<16x16xf32>
    %c44 = arith.constant 44 : index
    %249 = memref.load %arg1[%c44] : memref<98xf32, #tpu.memory_space<smem>>
    %250 = vector.extract_strided_slice %238 {offsets = [0, 2], sizes = [16, 16], strides = [1, 1]} : vector<16x22xf32> to vector<16x16xf32>
    %251 = vector.broadcast %249 : f32 to vector<16x16xf32>
    %252 = arith.mulf %251, %250 : vector<16x16xf32>
    %253 = arith.addf %248, %252 : vector<16x16xf32>
    %c45 = arith.constant 45 : index
    %254 = memref.load %arg1[%c45] : memref<98xf32, #tpu.memory_space<smem>>
    %255 = vector.extract_strided_slice %238 {offsets = [0, 3], sizes = [16, 16], strides = [1, 1]} : vector<16x22xf32> to vector<16x16xf32>
    %256 = vector.broadcast %254 : f32 to vector<16x16xf32>
    %257 = arith.mulf %256, %255 : vector<16x16xf32>
    %258 = arith.addf %253, %257 : vector<16x16xf32>
    %c46 = arith.constant 46 : index
    %259 = memref.load %arg1[%c46] : memref<98xf32, #tpu.memory_space<smem>>
    %260 = vector.extract_strided_slice %238 {offsets = [0, 4], sizes = [16, 16], strides = [1, 1]} : vector<16x22xf32> to vector<16x16xf32>
    %261 = vector.broadcast %259 : f32 to vector<16x16xf32>
    %262 = arith.mulf %261, %260 : vector<16x16xf32>
    %263 = arith.addf %258, %262 : vector<16x16xf32>
    %c47 = arith.constant 47 : index
    %264 = memref.load %arg1[%c47] : memref<98xf32, #tpu.memory_space<smem>>
    %265 = vector.extract_strided_slice %238 {offsets = [0, 5], sizes = [16, 16], strides = [1, 1]} : vector<16x22xf32> to vector<16x16xf32>
    %266 = vector.broadcast %264 : f32 to vector<16x16xf32>
    %267 = arith.mulf %266, %265 : vector<16x16xf32>
    %268 = arith.addf %263, %267 : vector<16x16xf32>
    %c48 = arith.constant 48 : index
    %269 = memref.load %arg1[%c48] : memref<98xf32, #tpu.memory_space<smem>>
    %270 = vector.extract_strided_slice %238 {offsets = [0, 6], sizes = [16, 16], strides = [1, 1]} : vector<16x22xf32> to vector<16x16xf32>
    %271 = vector.broadcast %269 : f32 to vector<16x16xf32>
    %272 = arith.mulf %271, %270 : vector<16x16xf32>
    %273 = arith.addf %268, %272 : vector<16x16xf32>
    %c1_38 = arith.constant 1 : index
    %c0_39 = arith.constant 0 : index
    %c0_40 = arith.constant 0 : index
    %274 = vector.load %arg4[%c1_38, %c0_39, %c0_40] : memref<2x22x22xf32, #tpu.memory_space<vmem>>, vector<1x16x22xf32>
    %275 = vector.shape_cast %274 : vector<1x16x22xf32> to vector<16x22xf32>
    %c49 = arith.constant 49 : index
    %276 = memref.load %arg1[%c49] : memref<98xf32, #tpu.memory_space<smem>>
    %277 = vector.extract_strided_slice %275 {offsets = [0, 0], sizes = [16, 16], strides = [1, 1]} : vector<16x22xf32> to vector<16x16xf32>
    %278 = vector.broadcast %276 : f32 to vector<16x16xf32>
    %279 = arith.mulf %278, %277 : vector<16x16xf32>
    %280 = arith.addf %273, %279 : vector<16x16xf32>
    %c50 = arith.constant 50 : index
    %281 = memref.load %arg1[%c50] : memref<98xf32, #tpu.memory_space<smem>>
    %282 = vector.extract_strided_slice %275 {offsets = [0, 1], sizes = [16, 16], strides = [1, 1]} : vector<16x22xf32> to vector<16x16xf32>
    %283 = vector.broadcast %281 : f32 to vector<16x16xf32>
    %284 = arith.mulf %283, %282 : vector<16x16xf32>
    %285 = arith.addf %280, %284 : vector<16x16xf32>
    %c51 = arith.constant 51 : index
    %286 = memref.load %arg1[%c51] : memref<98xf32, #tpu.memory_space<smem>>
    %287 = vector.extract_strided_slice %275 {offsets = [0, 2], sizes = [16, 16], strides = [1, 1]} : vector<16x22xf32> to vector<16x16xf32>
    %288 = vector.broadcast %286 : f32 to vector<16x16xf32>
    %289 = arith.mulf %288, %287 : vector<16x16xf32>
    %290 = arith.addf %285, %289 : vector<16x16xf32>
    %c52 = arith.constant 52 : index
    %291 = memref.load %arg1[%c52] : memref<98xf32, #tpu.memory_space<smem>>
    %292 = vector.extract_strided_slice %275 {offsets = [0, 3], sizes = [16, 16], strides = [1, 1]} : vector<16x22xf32> to vector<16x16xf32>
    %293 = vector.broadcast %291 : f32 to vector<16x16xf32>
    %294 = arith.mulf %293, %292 : vector<16x16xf32>
    %295 = arith.addf %290, %294 : vector<16x16xf32>
    %c53 = arith.constant 53 : index
    %296 = memref.load %arg1[%c53] : memref<98xf32, #tpu.memory_space<smem>>
    %297 = vector.extract_strided_slice %275 {offsets = [0, 4], sizes = [16, 16], strides = [1, 1]} : vector<16x22xf32> to vector<16x16xf32>
    %298 = vector.broadcast %296 : f32 to vector<16x16xf32>
    %299 = arith.mulf %298, %297 : vector<16x16xf32>
    %300 = arith.addf %295, %299 : vector<16x16xf32>
    %c54 = arith.constant 54 : index
    %301 = memref.load %arg1[%c54] : memref<98xf32, #tpu.memory_space<smem>>
    %302 = vector.extract_strided_slice %275 {offsets = [0, 5], sizes = [16, 16], strides = [1, 1]} : vector<16x22xf32> to vector<16x16xf32>
    %303 = vector.broadcast %301 : f32 to vector<16x16xf32>
    %304 = arith.mulf %303, %302 : vector<16x16xf32>
    %305 = arith.addf %300, %304 : vector<16x16xf32>
    %c55 = arith.constant 55 : index
    %306 = memref.load %arg1[%c55] : memref<98xf32, #tpu.memory_space<smem>>
    %307 = vector.extract_strided_slice %275 {offsets = [0, 6], sizes = [16, 16], strides = [1, 1]} : vector<16x22xf32> to vector<16x16xf32>
    %308 = vector.broadcast %306 : f32 to vector<16x16xf32>
    %309 = arith.mulf %308, %307 : vector<16x16xf32>
    %310 = arith.addf %305, %309 : vector<16x16xf32>
    %c1_41 = arith.constant 1 : index
    %c1_42 = arith.constant 1 : index
    %c0_43 = arith.constant 0 : index
    %311 = vector.load %arg4[%c1_41, %c1_42, %c0_43] : memref<2x22x22xf32, #tpu.memory_space<vmem>>, vector<1x16x22xf32>
    %312 = vector.shape_cast %311 : vector<1x16x22xf32> to vector<16x22xf32>
    %c56 = arith.constant 56 : index
    %313 = memref.load %arg1[%c56] : memref<98xf32, #tpu.memory_space<smem>>
    %314 = vector.extract_strided_slice %312 {offsets = [0, 0], sizes = [16, 16], strides = [1, 1]} : vector<16x22xf32> to vector<16x16xf32>
    %315 = vector.broadcast %313 : f32 to vector<16x16xf32>
    %316 = arith.mulf %315, %314 : vector<16x16xf32>
    %317 = arith.addf %310, %316 : vector<16x16xf32>
    %c57 = arith.constant 57 : index
    %318 = memref.load %arg1[%c57] : memref<98xf32, #tpu.memory_space<smem>>
    %319 = vector.extract_strided_slice %312 {offsets = [0, 1], sizes = [16, 16], strides = [1, 1]} : vector<16x22xf32> to vector<16x16xf32>
    %320 = vector.broadcast %318 : f32 to vector<16x16xf32>
    %321 = arith.mulf %320, %319 : vector<16x16xf32>
    %322 = arith.addf %317, %321 : vector<16x16xf32>
    %c58 = arith.constant 58 : index
    %323 = memref.load %arg1[%c58] : memref<98xf32, #tpu.memory_space<smem>>
    %324 = vector.extract_strided_slice %312 {offsets = [0, 2], sizes = [16, 16], strides = [1, 1]} : vector<16x22xf32> to vector<16x16xf32>
    %325 = vector.broadcast %323 : f32 to vector<16x16xf32>
    %326 = arith.mulf %325, %324 : vector<16x16xf32>
    %327 = arith.addf %322, %326 : vector<16x16xf32>
    %c59 = arith.constant 59 : index
    %328 = memref.load %arg1[%c59] : memref<98xf32, #tpu.memory_space<smem>>
    %329 = vector.extract_strided_slice %312 {offsets = [0, 3], sizes = [16, 16], strides = [1, 1]} : vector<16x22xf32> to vector<16x16xf32>
    %330 = vector.broadcast %328 : f32 to vector<16x16xf32>
    %331 = arith.mulf %330, %329 : vector<16x16xf32>
    %332 = arith.addf %327, %331 : vector<16x16xf32>
    %c60 = arith.constant 60 : index
    %333 = memref.load %arg1[%c60] : memref<98xf32, #tpu.memory_space<smem>>
    %334 = vector.extract_strided_slice %312 {offsets = [0, 4], sizes = [16, 16], strides = [1, 1]} : vector<16x22xf32> to vector<16x16xf32>
    %335 = vector.broadcast %333 : f32 to vector<16x16xf32>
    %336 = arith.mulf %335, %334 : vector<16x16xf32>
    %337 = arith.addf %332, %336 : vector<16x16xf32>
    %c61 = arith.constant 61 : index
    %338 = memref.load %arg1[%c61] : memref<98xf32, #tpu.memory_space<smem>>
    %339 = vector.extract_strided_slice %312 {offsets = [0, 5], sizes = [16, 16], strides = [1, 1]} : vector<16x22xf32> to vector<16x16xf32>
    %340 = vector.broadcast %338 : f32 to vector<16x16xf32>
    %341 = arith.mulf %340, %339 : vector<16x16xf32>
    %342 = arith.addf %337, %341 : vector<16x16xf32>
    %c62 = arith.constant 62 : index
    %343 = memref.load %arg1[%c62] : memref<98xf32, #tpu.memory_space<smem>>
    %344 = vector.extract_strided_slice %312 {offsets = [0, 6], sizes = [16, 16], strides = [1, 1]} : vector<16x22xf32> to vector<16x16xf32>
    %345 = vector.broadcast %343 : f32 to vector<16x16xf32>
    %346 = arith.mulf %345, %344 : vector<16x16xf32>
    %347 = arith.addf %342, %346 : vector<16x16xf32>
    %c1_44 = arith.constant 1 : index
    %c2_45 = arith.constant 2 : index
    %c0_46 = arith.constant 0 : index
    %348 = vector.load %arg4[%c1_44, %c2_45, %c0_46] : memref<2x22x22xf32, #tpu.memory_space<vmem>>, vector<1x16x22xf32>
    %349 = vector.shape_cast %348 : vector<1x16x22xf32> to vector<16x22xf32>
    %c63 = arith.constant 63 : index
    %350 = memref.load %arg1[%c63] : memref<98xf32, #tpu.memory_space<smem>>
    %351 = vector.extract_strided_slice %349 {offsets = [0, 0], sizes = [16, 16], strides = [1, 1]} : vector<16x22xf32> to vector<16x16xf32>
    %352 = vector.broadcast %350 : f32 to vector<16x16xf32>
    %353 = arith.mulf %352, %351 : vector<16x16xf32>
    %354 = arith.addf %347, %353 : vector<16x16xf32>
    %c64 = arith.constant 64 : index
    %355 = memref.load %arg1[%c64] : memref<98xf32, #tpu.memory_space<smem>>
    %356 = vector.extract_strided_slice %349 {offsets = [0, 1], sizes = [16, 16], strides = [1, 1]} : vector<16x22xf32> to vector<16x16xf32>
    %357 = vector.broadcast %355 : f32 to vector<16x16xf32>
    %358 = arith.mulf %357, %356 : vector<16x16xf32>
    %359 = arith.addf %354, %358 : vector<16x16xf32>
    %c65 = arith.constant 65 : index
    %360 = memref.load %arg1[%c65] : memref<98xf32, #tpu.memory_space<smem>>
    %361 = vector.extract_strided_slice %349 {offsets = [0, 2], sizes = [16, 16], strides = [1, 1]} : vector<16x22xf32> to vector<16x16xf32>
    %362 = vector.broadcast %360 : f32 to vector<16x16xf32>
    %363 = arith.mulf %362, %361 : vector<16x16xf32>
    %364 = arith.addf %359, %363 : vector<16x16xf32>
    %c66 = arith.constant 66 : index
    %365 = memref.load %arg1[%c66] : memref<98xf32, #tpu.memory_space<smem>>
    %366 = vector.extract_strided_slice %349 {offsets = [0, 3], sizes = [16, 16], strides = [1, 1]} : vector<16x22xf32> to vector<16x16xf32>
    %367 = vector.broadcast %365 : f32 to vector<16x16xf32>
    %368 = arith.mulf %367, %366 : vector<16x16xf32>
    %369 = arith.addf %364, %368 : vector<16x16xf32>
    %c67 = arith.constant 67 : index
    %370 = memref.load %arg1[%c67] : memref<98xf32, #tpu.memory_space<smem>>
    %371 = vector.extract_strided_slice %349 {offsets = [0, 4], sizes = [16, 16], strides = [1, 1]} : vector<16x22xf32> to vector<16x16xf32>
    %372 = vector.broadcast %370 : f32 to vector<16x16xf32>
    %373 = arith.mulf %372, %371 : vector<16x16xf32>
    %374 = arith.addf %369, %373 : vector<16x16xf32>
    %c68 = arith.constant 68 : index
    %375 = memref.load %arg1[%c68] : memref<98xf32, #tpu.memory_space<smem>>
    %376 = vector.extract_strided_slice %349 {offsets = [0, 5], sizes = [16, 16], strides = [1, 1]} : vector<16x22xf32> to vector<16x16xf32>
    %377 = vector.broadcast %375 : f32 to vector<16x16xf32>
    %378 = arith.mulf %377, %376 : vector<16x16xf32>
    %379 = arith.addf %374, %378 : vector<16x16xf32>
    %c69 = arith.constant 69 : index
    %380 = memref.load %arg1[%c69] : memref<98xf32, #tpu.memory_space<smem>>
    %381 = vector.extract_strided_slice %349 {offsets = [0, 6], sizes = [16, 16], strides = [1, 1]} : vector<16x22xf32> to vector<16x16xf32>
    %382 = vector.broadcast %380 : f32 to vector<16x16xf32>
    %383 = arith.mulf %382, %381 : vector<16x16xf32>
    %384 = arith.addf %379, %383 : vector<16x16xf32>
    %c1_47 = arith.constant 1 : index
    %c3_48 = arith.constant 3 : index
    %c0_49 = arith.constant 0 : index
    %385 = vector.load %arg4[%c1_47, %c3_48, %c0_49] : memref<2x22x22xf32, #tpu.memory_space<vmem>>, vector<1x16x22xf32>
    %386 = vector.shape_cast %385 : vector<1x16x22xf32> to vector<16x22xf32>
    %c70 = arith.constant 70 : index
    %387 = memref.load %arg1[%c70] : memref<98xf32, #tpu.memory_space<smem>>
    %388 = vector.extract_strided_slice %386 {offsets = [0, 0], sizes = [16, 16], strides = [1, 1]} : vector<16x22xf32> to vector<16x16xf32>
    %389 = vector.broadcast %387 : f32 to vector<16x16xf32>
    %390 = arith.mulf %389, %388 : vector<16x16xf32>
    %391 = arith.addf %384, %390 : vector<16x16xf32>
    %c71 = arith.constant 71 : index
    %392 = memref.load %arg1[%c71] : memref<98xf32, #tpu.memory_space<smem>>
    %393 = vector.extract_strided_slice %386 {offsets = [0, 1], sizes = [16, 16], strides = [1, 1]} : vector<16x22xf32> to vector<16x16xf32>
    %394 = vector.broadcast %392 : f32 to vector<16x16xf32>
    %395 = arith.mulf %394, %393 : vector<16x16xf32>
    %396 = arith.addf %391, %395 : vector<16x16xf32>
    %c72 = arith.constant 72 : index
    %397 = memref.load %arg1[%c72] : memref<98xf32, #tpu.memory_space<smem>>
    %398 = vector.extract_strided_slice %386 {offsets = [0, 2], sizes = [16, 16], strides = [1, 1]} : vector<16x22xf32> to vector<16x16xf32>
    %399 = vector.broadcast %397 : f32 to vector<16x16xf32>
    %400 = arith.mulf %399, %398 : vector<16x16xf32>
    %401 = arith.addf %396, %400 : vector<16x16xf32>
    %c73 = arith.constant 73 : index
    %402 = memref.load %arg1[%c73] : memref<98xf32, #tpu.memory_space<smem>>
    %403 = vector.extract_strided_slice %386 {offsets = [0, 3], sizes = [16, 16], strides = [1, 1]} : vector<16x22xf32> to vector<16x16xf32>
    %404 = vector.broadcast %402 : f32 to vector<16x16xf32>
    %405 = arith.mulf %404, %403 : vector<16x16xf32>
    %406 = arith.addf %401, %405 : vector<16x16xf32>
    %c74 = arith.constant 74 : index
    %407 = memref.load %arg1[%c74] : memref<98xf32, #tpu.memory_space<smem>>
    %408 = vector.extract_strided_slice %386 {offsets = [0, 4], sizes = [16, 16], strides = [1, 1]} : vector<16x22xf32> to vector<16x16xf32>
    %409 = vector.broadcast %407 : f32 to vector<16x16xf32>
    %410 = arith.mulf %409, %408 : vector<16x16xf32>
    %411 = arith.addf %406, %410 : vector<16x16xf32>
    %c75 = arith.constant 75 : index
    %412 = memref.load %arg1[%c75] : memref<98xf32, #tpu.memory_space<smem>>
    %413 = vector.extract_strided_slice %386 {offsets = [0, 5], sizes = [16, 16], strides = [1, 1]} : vector<16x22xf32> to vector<16x16xf32>
    %414 = vector.broadcast %412 : f32 to vector<16x16xf32>
    %415 = arith.mulf %414, %413 : vector<16x16xf32>
    %416 = arith.addf %411, %415 : vector<16x16xf32>
    %c76 = arith.constant 76 : index
    %417 = memref.load %arg1[%c76] : memref<98xf32, #tpu.memory_space<smem>>
    %418 = vector.extract_strided_slice %386 {offsets = [0, 6], sizes = [16, 16], strides = [1, 1]} : vector<16x22xf32> to vector<16x16xf32>
    %419 = vector.broadcast %417 : f32 to vector<16x16xf32>
    %420 = arith.mulf %419, %418 : vector<16x16xf32>
    %421 = arith.addf %416, %420 : vector<16x16xf32>
    %c1_50 = arith.constant 1 : index
    %c4_51 = arith.constant 4 : index
    %c0_52 = arith.constant 0 : index
    %422 = vector.load %arg4[%c1_50, %c4_51, %c0_52] : memref<2x22x22xf32, #tpu.memory_space<vmem>>, vector<1x16x22xf32>
    %423 = vector.shape_cast %422 : vector<1x16x22xf32> to vector<16x22xf32>
    %c77 = arith.constant 77 : index
    %424 = memref.load %arg1[%c77] : memref<98xf32, #tpu.memory_space<smem>>
    %425 = vector.extract_strided_slice %423 {offsets = [0, 0], sizes = [16, 16], strides = [1, 1]} : vector<16x22xf32> to vector<16x16xf32>
    %426 = vector.broadcast %424 : f32 to vector<16x16xf32>
    %427 = arith.mulf %426, %425 : vector<16x16xf32>
    %428 = arith.addf %421, %427 : vector<16x16xf32>
    %c78 = arith.constant 78 : index
    %429 = memref.load %arg1[%c78] : memref<98xf32, #tpu.memory_space<smem>>
    %430 = vector.extract_strided_slice %423 {offsets = [0, 1], sizes = [16, 16], strides = [1, 1]} : vector<16x22xf32> to vector<16x16xf32>
    %431 = vector.broadcast %429 : f32 to vector<16x16xf32>
    %432 = arith.mulf %431, %430 : vector<16x16xf32>
    %433 = arith.addf %428, %432 : vector<16x16xf32>
    %c79 = arith.constant 79 : index
    %434 = memref.load %arg1[%c79] : memref<98xf32, #tpu.memory_space<smem>>
    %435 = vector.extract_strided_slice %423 {offsets = [0, 2], sizes = [16, 16], strides = [1, 1]} : vector<16x22xf32> to vector<16x16xf32>
    %436 = vector.broadcast %434 : f32 to vector<16x16xf32>
    %437 = arith.mulf %436, %435 : vector<16x16xf32>
    %438 = arith.addf %433, %437 : vector<16x16xf32>
    %c80 = arith.constant 80 : index
    %439 = memref.load %arg1[%c80] : memref<98xf32, #tpu.memory_space<smem>>
    %440 = vector.extract_strided_slice %423 {offsets = [0, 3], sizes = [16, 16], strides = [1, 1]} : vector<16x22xf32> to vector<16x16xf32>
    %441 = vector.broadcast %439 : f32 to vector<16x16xf32>
    %442 = arith.mulf %441, %440 : vector<16x16xf32>
    %443 = arith.addf %438, %442 : vector<16x16xf32>
    %c81 = arith.constant 81 : index
    %444 = memref.load %arg1[%c81] : memref<98xf32, #tpu.memory_space<smem>>
    %445 = vector.extract_strided_slice %423 {offsets = [0, 4], sizes = [16, 16], strides = [1, 1]} : vector<16x22xf32> to vector<16x16xf32>
    %446 = vector.broadcast %444 : f32 to vector<16x16xf32>
    %447 = arith.mulf %446, %445 : vector<16x16xf32>
    %448 = arith.addf %443, %447 : vector<16x16xf32>
    %c82 = arith.constant 82 : index
    %449 = memref.load %arg1[%c82] : memref<98xf32, #tpu.memory_space<smem>>
    %450 = vector.extract_strided_slice %423 {offsets = [0, 5], sizes = [16, 16], strides = [1, 1]} : vector<16x22xf32> to vector<16x16xf32>
    %451 = vector.broadcast %449 : f32 to vector<16x16xf32>
    %452 = arith.mulf %451, %450 : vector<16x16xf32>
    %453 = arith.addf %448, %452 : vector<16x16xf32>
    %c83 = arith.constant 83 : index
    %454 = memref.load %arg1[%c83] : memref<98xf32, #tpu.memory_space<smem>>
    %455 = vector.extract_strided_slice %423 {offsets = [0, 6], sizes = [16, 16], strides = [1, 1]} : vector<16x22xf32> to vector<16x16xf32>
    %456 = vector.broadcast %454 : f32 to vector<16x16xf32>
    %457 = arith.mulf %456, %455 : vector<16x16xf32>
    %458 = arith.addf %453, %457 : vector<16x16xf32>
    %c1_53 = arith.constant 1 : index
    %c5_54 = arith.constant 5 : index
    %c0_55 = arith.constant 0 : index
    %459 = vector.load %arg4[%c1_53, %c5_54, %c0_55] : memref<2x22x22xf32, #tpu.memory_space<vmem>>, vector<1x16x22xf32>
    %460 = vector.shape_cast %459 : vector<1x16x22xf32> to vector<16x22xf32>
    %c84 = arith.constant 84 : index
    %461 = memref.load %arg1[%c84] : memref<98xf32, #tpu.memory_space<smem>>
    %462 = vector.extract_strided_slice %460 {offsets = [0, 0], sizes = [16, 16], strides = [1, 1]} : vector<16x22xf32> to vector<16x16xf32>
    %463 = vector.broadcast %461 : f32 to vector<16x16xf32>
    %464 = arith.mulf %463, %462 : vector<16x16xf32>
    %465 = arith.addf %458, %464 : vector<16x16xf32>
    %c85 = arith.constant 85 : index
    %466 = memref.load %arg1[%c85] : memref<98xf32, #tpu.memory_space<smem>>
    %467 = vector.extract_strided_slice %460 {offsets = [0, 1], sizes = [16, 16], strides = [1, 1]} : vector<16x22xf32> to vector<16x16xf32>
    %468 = vector.broadcast %466 : f32 to vector<16x16xf32>
    %469 = arith.mulf %468, %467 : vector<16x16xf32>
    %470 = arith.addf %465, %469 : vector<16x16xf32>
    %c86 = arith.constant 86 : index
    %471 = memref.load %arg1[%c86] : memref<98xf32, #tpu.memory_space<smem>>
    %472 = vector.extract_strided_slice %460 {offsets = [0, 2], sizes = [16, 16], strides = [1, 1]} : vector<16x22xf32> to vector<16x16xf32>
    %473 = vector.broadcast %471 : f32 to vector<16x16xf32>
    %474 = arith.mulf %473, %472 : vector<16x16xf32>
    %475 = arith.addf %470, %474 : vector<16x16xf32>
    %c87 = arith.constant 87 : index
    %476 = memref.load %arg1[%c87] : memref<98xf32, #tpu.memory_space<smem>>
    %477 = vector.extract_strided_slice %460 {offsets = [0, 3], sizes = [16, 16], strides = [1, 1]} : vector<16x22xf32> to vector<16x16xf32>
    %478 = vector.broadcast %476 : f32 to vector<16x16xf32>
    %479 = arith.mulf %478, %477 : vector<16x16xf32>
    %480 = arith.addf %475, %479 : vector<16x16xf32>
    %c88 = arith.constant 88 : index
    %481 = memref.load %arg1[%c88] : memref<98xf32, #tpu.memory_space<smem>>
    %482 = vector.extract_strided_slice %460 {offsets = [0, 4], sizes = [16, 16], strides = [1, 1]} : vector<16x22xf32> to vector<16x16xf32>
    %483 = vector.broadcast %481 : f32 to vector<16x16xf32>
    %484 = arith.mulf %483, %482 : vector<16x16xf32>
    %485 = arith.addf %480, %484 : vector<16x16xf32>
    %c89 = arith.constant 89 : index
    %486 = memref.load %arg1[%c89] : memref<98xf32, #tpu.memory_space<smem>>
    %487 = vector.extract_strided_slice %460 {offsets = [0, 5], sizes = [16, 16], strides = [1, 1]} : vector<16x22xf32> to vector<16x16xf32>
    %488 = vector.broadcast %486 : f32 to vector<16x16xf32>
    %489 = arith.mulf %488, %487 : vector<16x16xf32>
    %490 = arith.addf %485, %489 : vector<16x16xf32>
    %c90 = arith.constant 90 : index
    %491 = memref.load %arg1[%c90] : memref<98xf32, #tpu.memory_space<smem>>
    %492 = vector.extract_strided_slice %460 {offsets = [0, 6], sizes = [16, 16], strides = [1, 1]} : vector<16x22xf32> to vector<16x16xf32>
    %493 = vector.broadcast %491 : f32 to vector<16x16xf32>
    %494 = arith.mulf %493, %492 : vector<16x16xf32>
    %495 = arith.addf %490, %494 : vector<16x16xf32>
    %c1_56 = arith.constant 1 : index
    %c6_57 = arith.constant 6 : index
    %c0_58 = arith.constant 0 : index
    %496 = vector.load %arg4[%c1_56, %c6_57, %c0_58] : memref<2x22x22xf32, #tpu.memory_space<vmem>>, vector<1x16x22xf32>
    %497 = vector.shape_cast %496 : vector<1x16x22xf32> to vector<16x22xf32>
    %c91 = arith.constant 91 : index
    %498 = memref.load %arg1[%c91] : memref<98xf32, #tpu.memory_space<smem>>
    %499 = vector.extract_strided_slice %497 {offsets = [0, 0], sizes = [16, 16], strides = [1, 1]} : vector<16x22xf32> to vector<16x16xf32>
    %500 = vector.broadcast %498 : f32 to vector<16x16xf32>
    %501 = arith.mulf %500, %499 : vector<16x16xf32>
    %502 = arith.addf %495, %501 : vector<16x16xf32>
    %c92 = arith.constant 92 : index
    %503 = memref.load %arg1[%c92] : memref<98xf32, #tpu.memory_space<smem>>
    %504 = vector.extract_strided_slice %497 {offsets = [0, 1], sizes = [16, 16], strides = [1, 1]} : vector<16x22xf32> to vector<16x16xf32>
    %505 = vector.broadcast %503 : f32 to vector<16x16xf32>
    %506 = arith.mulf %505, %504 : vector<16x16xf32>
    %507 = arith.addf %502, %506 : vector<16x16xf32>
    %c93 = arith.constant 93 : index
    %508 = memref.load %arg1[%c93] : memref<98xf32, #tpu.memory_space<smem>>
    %509 = vector.extract_strided_slice %497 {offsets = [0, 2], sizes = [16, 16], strides = [1, 1]} : vector<16x22xf32> to vector<16x16xf32>
    %510 = vector.broadcast %508 : f32 to vector<16x16xf32>
    %511 = arith.mulf %510, %509 : vector<16x16xf32>
    %512 = arith.addf %507, %511 : vector<16x16xf32>
    %c94 = arith.constant 94 : index
    %513 = memref.load %arg1[%c94] : memref<98xf32, #tpu.memory_space<smem>>
    %514 = vector.extract_strided_slice %497 {offsets = [0, 3], sizes = [16, 16], strides = [1, 1]} : vector<16x22xf32> to vector<16x16xf32>
    %515 = vector.broadcast %513 : f32 to vector<16x16xf32>
    %516 = arith.mulf %515, %514 : vector<16x16xf32>
    %517 = arith.addf %512, %516 : vector<16x16xf32>
    %c95 = arith.constant 95 : index
    %518 = memref.load %arg1[%c95] : memref<98xf32, #tpu.memory_space<smem>>
    %519 = vector.extract_strided_slice %497 {offsets = [0, 4], sizes = [16, 16], strides = [1, 1]} : vector<16x22xf32> to vector<16x16xf32>
    %520 = vector.broadcast %518 : f32 to vector<16x16xf32>
    %521 = arith.mulf %520, %519 : vector<16x16xf32>
    %522 = arith.addf %517, %521 : vector<16x16xf32>
    %c96 = arith.constant 96 : index
    %523 = memref.load %arg1[%c96] : memref<98xf32, #tpu.memory_space<smem>>
    %524 = vector.extract_strided_slice %497 {offsets = [0, 5], sizes = [16, 16], strides = [1, 1]} : vector<16x22xf32> to vector<16x16xf32>
    %525 = vector.broadcast %523 : f32 to vector<16x16xf32>
    %526 = arith.mulf %525, %524 : vector<16x16xf32>
    %527 = arith.addf %522, %526 : vector<16x16xf32>
    %c97 = arith.constant 97 : index
    %528 = memref.load %arg1[%c97] : memref<98xf32, #tpu.memory_space<smem>>
    %529 = vector.extract_strided_slice %497 {offsets = [0, 6], sizes = [16, 16], strides = [1, 1]} : vector<16x22xf32> to vector<16x16xf32>
    %530 = vector.broadcast %528 : f32 to vector<16x16xf32>
    %531 = arith.mulf %530, %529 : vector<16x16xf32>
    %532 = arith.addf %527, %531 : vector<16x16xf32>
    %cst_59 = arith.constant 0.000000e+00 : f32
    %533 = vector.broadcast %cst_59 : f32 to vector<16x16xf32>
    %534 = arith.subf %533, %532 : vector<16x16xf32>
    %535 = math.exp %534 : vector<16x16xf32>
    %cst_60 = arith.constant 1.000000e+00 : f32
    %536 = vector.broadcast %cst_60 : f32 to vector<16x16xf32>
    %537 = arith.addf %536, %535 : vector<16x16xf32>
    %cst_61 = arith.constant 1.000000e+00 : f32
    %538 = vector.broadcast %cst_61 : f32 to vector<16x16xf32>
    %539 = arith.divf %538, %537 : vector<16x16xf32>
    %c0_62 = arith.constant 0 : index
    %c0_63 = arith.constant 0 : index
    %c0_64 = arith.constant 0 : index
    %c0_65 = arith.constant 0 : index
    %540 = vector.load %arg3[%c0_62, %c0_63, %c0_64, %c0_65] : memref<1x1x16x16xf32, #tpu.memory_space<vmem>>, vector<1x1x16x16xf32>
    %541 = vector.shape_cast %540 : vector<1x1x16x16xf32> to vector<16x16xf32>
    %542 = vector.shape_cast %539 : vector<16x16xf32> to vector<1x1x16x16xf32>
    tpu.vector_store %arg3[%c0_62, %c0_63, %c0_64, %c0_65], %542 {strides = array<i32>} : memref<1x1x16x16xf32, #tpu.memory_space<vmem>>, vector<1x1x16x16xf32>,
    return
  }
  func.func @transform_0(%arg0: i32) -> i32 {
    %c0_i32 = arith.constant 0 : i32
    %c0_i32_0 = arith.constant 0 : i32
    return %c0_i32 : i32
  }
  func.func @transform_1(%arg0: i32) -> (i32, i32, i32, i32) {
    %c0_i32 = arith.constant 0 : i32
    %c0_i32_0 = arith.constant 0 : i32
    %c0_i32_1 = arith.constant 0 : i32
    %c0_i32_2 = arith.constant 0 : i32
    return %arg0, %c0_i32, %c0_i32_0, %c0_i32_1 : i32, i32, i32, i32
  }
  func.func @transform_2(%arg0: i32) -> (i32, i32, i32, i32) {
    %c0_i32 = arith.constant 0 : i32
    %c0_i32_0 = arith.constant 0 : i32
    %c0_i32_1 = arith.constant 0 : i32
    %c0_i32_2 = arith.constant 0 : i32
    return %arg0, %c0_i32, %c0_i32_0, %c0_i32_1 : i32, i32, i32, i32
  }
}

</mosaic_0001>

<bundles_post_ra>
// kernel: tpu_custom_call.1
= control target key start
LH: loop header
LB: loop body
LE: loop exit
PB: predicated region body
PF: predicated region fallthrough
CT: control target
= control target key end

     0   :  { %7 = vsyncpa [#allocation6], 0  ;;  %s2833_s0 = inlined_call_operand.hbm [shape: f32[98], index: 0, kind: input, shape index: {}]   ;;  %s2834_s1 = inlined_call_operand.hbm [shape: f32[2,4,16,16], index: 1, kind: input, shape index: {}]   ;;  %s2835_s2 = inlined_call_operand.hbm [shape: f32[2,1,16,16], index: 2, kind: output, shape index: {}]  }
   0x1   :  { %8 = vsyncpa [#allocation4], 0 }
   0x2   :  { %10 = vsyncpa [#allocation4 + $0x1], 0 }
   0x3   :  { %11 = vsyncpa [#allocation5], 0 }
   0x4   :  { %13 = vsyncpa [#allocation5 + $0x1], 0  ;;  %s2024_s9 = smov 0   ;;  %s2026_s10 = smov 0  }
   0x5   :  { %s2028_s11 = smov 0   ;;  %s2030_s12 = smov 0  }
   0x6 LB: > { %s2045_s13 = sadd.s32 4294967295, %s1993_s12   ;;  %s1683_s14 = sadd.s32 4294967294, %s1993_s12   ;;  %s1993_s12 = sphi %s2030_s12, %s2846_s12   ;;  %s1989_s11 = sphi %s2028_s11, %s2845_s11   ;;  %s1985_s10 = sphi %s2026_s10, %s2844_s10   ;;  %s1981_s9 = sphi %s2024_s9, %s2843_s9  }
   0x7   : > { %s2049_s15 = sadd.s32 1, %s1993_s12   ;;  %s47_s16 = sadd.s32 1, %s1989_s11 }
   0x8   : > { %s44_s17 = ssub.s32 %s1993_s12, %s2049_s15  ;;  %p54_p0 = scmp.ne.s32.totalorder %s1989_s11, %s1985_s10 }
   0x9   : > { %p45_p1 = scmp.eq.s32.totalorder %s44_s17, 0  ;;  %p55_p2 = scmp.eq.s32.totalorder %s1993_s12, 0 }
   0xa   : > { %p60_p3 = scmp.ne.s32.totalorder %s1985_s10, %s1981_s9  ;;  %p61_p4 = scmp.eq.s32.totalorder %s2045_s13, 0 }
   0xb   : > { %s2061_s18 = scalar_select %p45_p1, %s1989_s11, %s47_s16  }
   0xc   : > { %p2063_p5 = por %p55_p2, %p54_p0  ;;  %p2069_p6 = por %p61_p4, %p60_p3 }
   0xd   : > { %p84_p7 = scmp.eq.s32.totalorder %s2045_s13, 1  ;;  %p90_p8 = scmp.eq.s32.totalorder %s1683_s14, 1 }
   0xe   : > { %p1684_p9 = scmp.ge.s32.totalorder %s1993_s12, 1  ;;  %p97_p10 = scmp.lt.s32.totalorder %s1993_s12, 3 }
   0xf   : > { %p2076_p11 = por %p84_p7, %p54_p0  ;;  %p2080_p12 = por %p90_p8, %p60_p3 }
  0x10   : > { %p2084_p13 = pnand %p1684_p9, %p97_p10  ;;  %s109_s26 = sshll.u32 %s2833_s0, 4  ;;  %s110_s26 = int_to_ptr.hbm [resolvable:$true] %s109_s26 }
  0x11   : > { %p1819_p2 = scmp.lt.s32.totalorder %s1993_s12, 2  ;;  %s120_s27 = sand.u32 1, %s1989_s11  }
  0x12   : > { %p1806_p1 = pneg %p2084_p13  ;;  %s1687_s29 = sshll.u32 %s120_s27, 6 }
  0x13   : > { %p2100_p3 = pnand %p1819_p2, %p2063_p5  ;;  %s1995_s30 = smov [#allocation3]  }
  0x14   : > { %p1807_p7 = pnand %p1806_p1, %p61_p4  ;;  %s1796_s3 = sshll.u32 %s1993_s12, 6 }
  0x15   : > { %s124_s4 = scalar_lea.vmem [#allocation7], %s1687_s29  ;;  %s129_s8 = scalar_lea.hbm %s2834_s1, %s1796_s3 }
  0x16   : > { %1809 = dma.hbm_to_smem (!%p1807_p7), %s110_s26, 16, %s1995_s30, [#allocation6]  }
  0x17   : > { %s132_s5 = sshll.u32 %s124_s4, 4  ;;  %s130_s14 = sshll.u32 %s129_s8, 4  ;;  %s133_s5 = int_to_ptr.vmem [resolvable:$true] %s132_s5  ;;  %s131_s14 = int_to_ptr.hbm [resolvable:$true] %s130_s14 }
  0x18   : > { %s121_s16 = scalar_lea.sflag [#allocation4], %s120_s27  ;;  %s1893_s17 = sshra.s32 %s131_s14, 4  ;;  %s1894_s17 = int_to_ptr.hbm [resolvable:$true] %s1893_s17 }
  0x19   : > { %s1895_s19 = scalar_lea.hbm %s1894_s17, 64  ;;  %p1897_p8 = pneg %p2100_p3 }
  0x1a   : > { %p1896_p5 = scmp.ne.s32.totalorder %s1894_s17, %s1895_s19  ;;  %s1900_s26 = scalar_lea.hbm %s2834_s1, 128 }
  0x1b   : > { %p1901_p1 = scmp.lt.s32.totalorder %s1894_s17, %s2834_s1  ;;  %p1902_p2 = scmp.lt.s32.totalorder %s1900_s26, %s1895_s19 }
  0x1c   : > { %p1898_p9 = pnand %p1897_p8, %p1896_p5 }
  0x1d   : > { %p1903_p7 = por %p1902_p2, %p1901_p1 }
  0x1e   : > { %p1899_p10 = pneg %p1898_p9 }
  0x20   : > { %p1904_p0 = pnand %p1903_p7, %p1899_p10 }
  0x22   : > { %1907 = shalt.err (!%p1904_p0)
}
  0x23   : > { %s1996_s27 = smov 128   ;;  %s1997_s3 = smov 8  }
  0x24   : > { %1813 = dma.hbm_to_vmem [thread:$0]  (!%p2100_p3), %s131_s14, 1024, %s133_s5, %s121_s16, %s1996_s27, %s1996_s27, %s1997_s3  }
  0x25   : > { %144 = sbr.rel (%p2084_p13) target bundleno = 786 (0x312), region = 28 }
  0x2a   : > { %1968 = dma.done.wait (%p61_p4), [#allocation6], 16  }
  0x2b   : > { %1970 = vsyncadd (%p61_p4), [#allocation6], 4294967280  ;;  %s2125_s4 = sand.u32 1, %s1985_s10  }
  0x2c   : > { %s1692_s6 = sshll.u32 %s2125_s4, 6  ;;  %s152_s7 = scalar_lea.sflag [#allocation4], %s2125_s4 }
  0x2d   : > { %s2129_s8 = scalar_lea.vmem [#allocation7], %s1692_s6 }
  0x2e   : > { %1972 = dma.done.wait (%p2069_p6), %s152_s7, 1024  }
  0x2f   : > { %1974 = vsyncadd (%p2069_p6), %s152_s7, 4294966272 }
  0x30   : > { %161 = sfence }
  0x31   : > { %v178_v0 = vld [vmem:[%s2129_s8] sm:$0xff]  ;;  %v180_v1 = vld [vmem:[%s2129_s8 + $0x10] sm:$0xff]  ;;  %vm186_vm0 = vcmask 130048   ;;  %v1998_v2 = vmov 4.0   ;;  %v179_v11 = vld [vmem:[%s2129_s8 + $0x8] sm:$0xff]  ;;  %vm224_vm1 = vcmask 179200  }
  0x32   : > { %1868 = vrcp.f32 %v1998_v2  ;;  %v187_v3 = vsel %vm186_vm0, %v178_v0, 0.0  ;;  %v188_v4 = vsel %vm186_vm0, %v180_v1, 0.0  ;;  %v182_v5 = vld [vmem:[%s2129_s8 + $0x20] sm:$0xff]  ;;  %v184_v6 = vld [vmem:[%s2129_s8 + $0x30] sm:$0xff]  ;;  %v210_v7 = vsel %vm186_vm0, %v178_v0, -inf  ;;  %v181_v12 = vld [vmem:[%s2129_s8 + $0x18] sm:$0xff] }
  0x33   : > { %v211_v8 = vsel %vm186_vm0, %v180_v1, -inf  ;;  %v212_v9 = vsel %vm186_vm0, %v182_v5, -inf  ;;  %v214_v10 = vsel %vm186_vm0, %v184_v6, -inf  ;;  %v189_v13 = vadd.f32 %v188_v4, %v187_v3  ;;  %v183_v23 = vld [vmem:[%s2129_s8 + $0x28] sm:$0xff]  ;;  %s2000_s20 = smov 3   ;;  %v185_v30 = vld [vmem:[%s2129_s8 + $0x38] sm:$0xff] }
  0x34   : > { %v213_v14 = vmax.f32 %v210_v7, %v212_v9  ;;  %v215_v15 = vmax.f32 %v211_v8, %v214_v10  ;;  %v190_v16 = vsel %vm186_vm0, %v182_v5, 0.0  ;;  %v1999_v19 = vmov 0.0   ;;  %s1695_s23 = sld [smem:[#allocation3 + $0x2]]  ;;  %s2001_s14 = smov 126  }
  0x35   : > { %225 = vst.msk [vmem:[#allocation2] sm:$0xff] %vm224_vm1, %v1999_v19  ;;  %v194_v20 = vsel %vm186_vm0, %v179_v11, 0.0  ;;  %v195_v21 = vsel %vm186_vm0, %v181_v12, 0.0  ;;  %v191_v24 = vadd.f32 %v190_v16, %v189_v13  ;;  %v192_v25 = vsel %vm186_vm0, %v184_v6, 0.0  ;;  %s1694_s28 = sld [smem:[#allocation3 + $0x1]]  ;;  %s2002_s16 = smov 127  }
  0x36   : > { %v216_v18 = vmax.f32 %v213_v14, %v215_v15  ;;  %226 = vst.msk [vmem:[#allocation2 + $0x8] sm:$0xff] %vm224_vm1, %v1999_v19  ;;  %v196_v27 = vadd.f32 %v195_v21, %v194_v20  ;;  %v197_v28 = vsel %vm186_vm0, %v183_v23, 0.0  ;;  %v199_v34 = vsel %vm186_vm0, %v185_v30, 0.0  ;;  %s1696_s5 = sld [smem:[#allocation3 + $0x3]]  ;;  %s2003_s24 = smov 125  }
  0x37   : > { %229 = vst.msk [vmem:[#allocation2 + $0x18] sm:$0xff] %vm224_vm1, %v1999_v19  ;;  %v193_v31 = vadd.f32 %v192_v25, %v191_v24  ;;  %v217_v39 = vsel %vm186_vm0, %v179_v11, -inf  ;;  %v218_v40 = vsel %vm186_vm0, %v181_v12, -inf  ;;  %v219_v41 = vsel %vm186_vm0, %v183_v23, -inf  ;;  %s1698_s17 = sld [smem:[#allocation3 + $0x5]]  ;;  %s2004_s26 = smov 123  }
  0x38   : > { %v1869_v17 = vpop.eup %1868  ;;  %245 = vrot.lane.b32.xlu1 %v216_v18, %s2000_s20  ;;  %230 = vst.msk [vmem:[#allocation2 + $0x20] sm:$0xff] %vm224_vm1, %v1999_v19  ;;  %v198_v33 = vadd.f32 %v197_v28, %v196_v27  ;;  %v221_v42 = vsel %vm186_vm0, %v185_v30, -inf  ;;  %v220_v43 = vmax.f32 %v217_v39, %v219_v41  ;;  %vm227_vm3 = vcmask 177152   ;;  %s1697_s19 = sld [smem:[#allocation3 + $0x4]]  ;;  %s2005_s29 = smov 124  }
  0x39   : > { %v202_v22 = vmul.f32 4.0, %v1869_v17  ;;  %vm206_vm2 = vweird.f32 %v1869_v17  ;;  %v222_v44 = vmax.f32 %v218_v40, %v221_v42  ;;  %228 = vst.msk [vmem:[#allocation2 + $0x10] sm:$0x3f] %vm227_vm3, %v1999_v19  ;;  %vm240_vm4 = vcmask 154648   ;;  %s1699_s25 = sld [smem:[#allocation3 + $0x6]]  ;;  %s2006_s3 = smov 122  }
  0x3a   : > { %v200_v37 = vadd.f32 %v199_v34, %v198_v33  ;;  %231 = vst.msk [vmem:[#allocation2 + $0x28] sm:$0x3f] %vm227_vm3, %v1999_v19  ;;  %v277_v47 = vstv %s1695_s23  ;;  %s1702_s30 = sld [smem:[#allocation3 + $0x9]] }
  0x3b   : > { %v203_v26 = vsub.f32 1.0, %v202_v22  ;;  %v223_v45 = vmax.f32 %v220_v43, %v222_v44  ;;  %v263_v48 = vstv %s1694_s28  ;;  %s1701_s27 = sld [smem:[#allocation3 + $0x8]] }
  0x3c   : > { %v291_v55 = vstv %s1696_s5  ;;  %s1703_s6 = sld [smem:[#allocation3 + $0xa]] }
  0x3d   : > { %v204_v29 = vmul.f32 %v1869_v17, %v203_v26  ;;  %v319_v58 = vstv %s1698_s17  ;;  %s1705_s7 = sld [smem:[#allocation3 + $0xc]] }
  0x3e   : > { %v305_v59 = vstv %s1697_s19  ;;  %s1704_s8 = sld [smem:[#allocation3 + $0xb]] }
  0x3f   : > { %v205_v32 = vadd.f32 %v1869_v17, %v204_v29  ;;  %v333_v63 = vstv %s1699_s25  ;;  %s1709_s23 = sld [smem:[#allocation3 + $0x10]] }
  0x40   : > { %247 = vrot.lane.b32.xlu1 %v223_v45, %s2000_s20  ;;  %v369_v4 = vstv %s1702_s30  ;;  %s1708_s28 = sld [smem:[#allocation3 + $0xf]] }
  0x41   : > { %v207_v35 = vsel %vm206_vm2, %v1869_v17, %v205_v32  ;;  %v355_v5 = vstv %s1701_s27  ;;  %s1710_s5 = sld [smem:[#allocation3 + $0x11]] }
  0x42   : > { %v208_v36 = vmul.f32 %v207_v35, %v193_v31  ;;  %v209_v38 = vmul.f32 %v207_v35, %v200_v37  ;;  %v383_v10 = vstv %s1703_s6  ;;  %s1712_s17 = sld [smem:[#allocation3 + $0x13]] }
  0x43   : > { %v411_v14 = vstv %s1705_s7  ;;  %s1711_s19 = sld [smem:[#allocation3 + $0x12]] }
  0x44   : > { %234 = vrot.lane.b32.xlu0 %v208_v36, %s2000_s20  ;;  %v397_v15 = vstv %s1704_s8  ;;  %s1713_s25 = sld [smem:[#allocation3 + $0x14]] }
  0x45   : > { %v461_v24 = vstv %s1709_s23  ;;  %s1716_s30 = sld [smem:[#allocation3 + $0x17]] }
  0x46   : > { %v447_v25 = vstv %s1708_s28  ;;  %s1715_s27 = sld [smem:[#allocation3 + $0x16]] }
  0x47   : > { %v475_v31 = vstv %s1710_s5  ;;  %s1717_s6 = sld [smem:[#allocation3 + $0x18]] }
  0x48   : > { %v503_v36 = vstv %s1712_s17  ;;  %s1719_s7 = sld [smem:[#allocation3 + $0x1a]] }
  0x49   : > { %v489_v37 = vstv %s1711_s19  ;;  %s1718_s8 = sld [smem:[#allocation3 + $0x19]] }
  0x4a   : > { %v517_v41 = vstv %s1713_s25  ;;  %s256_s23 = sld [smem:[#allocation3]] }
  0x4b   : > { %s2273_s28 = sld [smem:[#allocation3 + $0x1e]] }
  0x4c   : > { %236 = vrot.lane.b32.xlu0 %v209_v38, %s2000_s20  ;;  %s1706_s20 = sld [smem:[#allocation3 + $0xd]] }
  0x4d   : > { %s2275_s5 = sld [smem:[#allocation3 + $0x1d]] }
  0x4e   : > { %s2289_s17 = sld [smem:[#allocation3 + $0x1f]] }
  0x4f   : > { %s2291_s19 = sld [smem:[#allocation3 + $0x7]] }
  0x50   : > { %s2300_s25 = sld [smem:[#allocation3 + $0x21]] }
  0x52   : > { %v425_v19 = vstv %s1706_s20  ;;  %s2265_s20 = sld [smem:[#allocation3 + $0x1b]] }
  0xaa   : > { %v246_v29 = vpop.permute.xlu1 %245 }
  0xab   : > { %252 = vst.msk [vmem:[#allocation2 + $0x1b] sm:$0xff] %vm240_vm4, %v246_v29 }
  0xb2   : > { %v248_v35 = vpop.permute.xlu1 %247 }
  0xb3   : > { %253 = vst.msk [vmem:[#allocation2 + $0x23] sm:$0xff] %vm240_vm4, %v248_v35 }
  0xb6   : > { %v235_v46 = vpop.permute.xlu0 %234 }
  0xb7   : > { %241 = vst.msk [vmem:[#allocation2 + $0x3] sm:$0xff] %vm240_vm4, %v235_v46 }
  0xbe   : > { %v2164_v49 = vld [vmem:[#allocation2] sm:$0xff]  ;;  %v237_v50 = vpop.permute.xlu0 %236 }
  0xbf   : > { %242 = vst.msk [vmem:[#allocation2 + $0xb] sm:$0xff] %vm240_vm4, %v237_v50  ;;  %v278_v51 = vmul.f32 %v277_v47, %v2164_v49  ;;  %v264_v52 = vmul.f32 %v263_v48, %v2164_v49  ;;  %v320_v60 = vmul.f32 %v319_v58, %v2164_v49  ;;  %v306_v61 = vmul.f32 %v305_v59, %v2164_v49  ;;  %v2191_v3 = vld [vmem:[#allocation2 + $0x1] sm:$0xff] }
  0xc0   : > { %v292_v62 = vmul.f32 %v291_v55, %v2164_v49  ;;  %v370_v6 = vmul.f32 %v369_v4, %v2191_v3  ;;  %v356_v7 = vmul.f32 %v355_v5, %v2191_v3  ;;  %v334_v8 = vmul.f32 %v333_v63, %v2164_v49  ;;  %v2219_v23 = vld [vmem:[#allocation2 + $0x2] sm:$0xff] }
  0xc1   : > { %282 = vrot.lane.b32.xlu0 %v278_v51, %s2001_s14  ;;  %268 = vrot.lane.b32.xlu2 %v264_v52, %s2002_s16  ;;  %v412_v16 = vmul.f32 %v411_v14, %v2191_v3  ;;  %v398_v17 = vmul.f32 %v397_v15, %v2191_v3  ;;  %v384_v18 = vmul.f32 %v383_v10, %v2191_v3  ;;  %v2249_v46 = vld [vmem:[#allocation2 + $0x3] sm:$0xff] }
  0xc2   : > { %v462_v26 = vmul.f32 %v461_v24, %v2219_v23  ;;  %v448_v27 = vmul.f32 %v447_v25, %v2219_v23  ;;  %v426_v28 = vmul.f32 %v425_v19, %v2191_v3  ;;  %v504_v38 = vmul.f32 %v503_v36, %v2219_v23 }
  0xc3   : > { %v490_v39 = vmul.f32 %v489_v37, %v2219_v23  ;;  %v476_v40 = vmul.f32 %v475_v31, %v2219_v23  ;;  %v518_v52 = vmul.f32 %v517_v41, %v2219_v23 }
  0xc6   : > { %v2171_v53 = vld [vmem:[#allocation2 + $0x8] sm:$0xff] }
  0xc7   : > { %v265_v54 = vmul.f32 %v263_v48, %v2171_v53  ;;  %v293_v56 = vmul.f32 %v291_v55, %v2171_v53  ;;  %v279_v57 = vmul.f32 %v277_v47, %v2171_v53  ;;  %v335_v0 = vmul.f32 %v333_v63, %v2171_v53  ;;  %v2199_v9 = vld [vmem:[#allocation2 + $0x9] sm:$0xff] }
  0xc8   : > { %v321_v1 = vmul.f32 %v319_v58, %v2171_v53  ;;  %v307_v2 = vmul.f32 %v305_v59, %v2171_v53  ;;  %v385_v11 = vmul.f32 %v383_v10, %v2199_v9  ;;  %v371_v12 = vmul.f32 %v369_v4, %v2199_v9  ;;  %v2228_v30 = vld [vmem:[#allocation2 + $0xa] sm:$0xff] }
  0xc9   : > { %298 = vrot.lane.b32.xlu0 %v293_v56, %s2003_s24  ;;  %284 = vrot.lane.b32.xlu1 %v279_v57, %s2001_s14  ;;  %v357_v13 = vmul.f32 %v355_v5, %v2199_v9  ;;  %v427_v20 = vmul.f32 %v425_v19, %v2199_v9  ;;  %v413_v21 = vmul.f32 %v411_v14, %v2199_v9  ;;  %v553_v47 = vstv %s1716_s30  ;;  %s2305_s30 = sld [smem:[#allocation3 + $0x20]] }
  0xca   : > { %270 = vrot.lane.b32.xlu2 %v265_v54, %s2002_s16  ;;  %v399_v22 = vmul.f32 %v397_v15, %v2199_v9  ;;  %v477_v32 = vmul.f32 %v475_v31, %v2228_v30  ;;  %v463_v33 = vmul.f32 %v461_v24, %v2228_v30  ;;  %v449_v34 = vmul.f32 %v447_v25, %v2228_v30  ;;  %v2257_v54 = vld [vmem:[#allocation2 + $0xb] sm:$0xff] }
  0xcb   : > { %v519_v42 = vmul.f32 %v517_v41, %v2228_v30  ;;  %v505_v43 = vmul.f32 %v503_v36, %v2228_v30  ;;  %v491_v44 = vmul.f32 %v489_v37, %v2228_v30  ;;  %v539_v48 = vstv %s1715_s27  ;;  %v2302_v31 = vld [vmem:[#allocation2 + $0xc] sm:$0xff]  ;;  %s2317_s27 = sld [smem:[#allocation3 + $0x22]] }
  0xcc   : > { %v554_v50 = vmul.f32 %v553_v47, %v2249_v46  ;;  %v540_v51 = vmul.f32 %v539_v48, %v2249_v46  ;;  %v567_v56 = vstv %s1717_s6  ;;  %v555_v58 = vmul.f32 %v553_v47, %v2257_v54  ;;  %s2326_s6 = sld [smem:[#allocation3 + $0x25]] }
  0xcd   : > { %v569_v57 = vmul.f32 %v567_v56, %v2257_v54  ;;  %v541_v59 = vmul.f32 %v539_v48, %v2257_v54  ;;  %v609_v5 = vstv %s2265_s20  ;;  %v687_v48 = vstv %s2300_s25  ;;  %s2343_s20 = sld [smem:[#allocation3 + $0xe]] }
  0xce   : > { %v610_v24 = vmul.f32 %v609_v5, %v2249_v46  ;;  %s2392_s25 = sld [smem:[#allocation3 + $0x2d]] }
  0xd1   : > { %324 = vrot.lane.b32.xlu0 %v320_v60, %s2004_s26  ;;  %310 = vrot.lane.b32.xlu1 %v306_v61, %s2005_s29  ;;  %v595_v61 = vstv %s1719_s7  ;;  %s2329_s7 = sld [smem:[#allocation3 + $0x24]] }
  0xd2   : > { %296 = vrot.lane.b32.xlu2 %v292_v62, %s2003_s24  ;;  %v581_v62 = vstv %s1718_s8  ;;  %v596_v63 = vmul.f32 %v595_v61, %v2249_v46  ;;  %s2341_s8 = sld [smem:[#allocation3 + $0x26]] }
  0xd3   : > { %v583_v10 = vmul.f32 %v581_v62, %v2257_v54 }
  0xd9   : > { %340 = vrot.lane.b32.xlu0 %v335_v0, %s2006_s3  ;;  %326 = vrot.lane.b32.xlu1 %v321_v1, %s2004_s26  ;;  %v582_v0 = vmul.f32 %v581_v62, %v2249_v46  ;;  %v568_v1 = vmul.f32 %v567_v56, %v2249_v46  ;;  %v689_v62 = vmul.f32 %v687_v48, %v2302_v31 }
  0xda   : > { %312 = vrot.lane.b32.xlu2 %v307_v2, %s2005_s29 }
  0xe1   : > { %374 = vrot.lane.b32.xlu0 %v370_v6, %s2001_s14  ;;  %360 = vrot.lane.b32.xlu1 %v356_v7, %s2002_s16  ;;  %v257_v6 = vstv %s256_s23  ;;  %v611_v7 = vmul.f32 %v609_v5, %v2257_v54  ;;  %v2337_v5 = vld [vmem:[#allocation2 + $0x5] sm:$0xff]  ;;  %s2351_s23 = sld [smem:[#allocation3 + $0x28]] }
  0xe2   : > { %338 = vrot.lane.b32.xlu2 %v334_v8, %s2006_s3  ;;  %v597_v8 = vmul.f32 %v595_v61, %v2257_v54  ;;  %v259_v19 = vmul.f32 %v257_v6, %v2171_v53 }
  0xe9   : > { %390 = vrot.lane.b32.xlu0 %v385_v11, %s2003_s24  ;;  %376 = vrot.lane.b32.xlu1 %v371_v12, %s2001_s14  ;;  %v258_v11 = vmul.f32 %v257_v6, %v2164_v49  ;;  %v737_v6 = vstv %s2326_s6  ;;  %s2407_s6 = sld [smem:[#allocation3 + $0x2e]] }
  0xea   : > { %362 = vrot.lane.b32.xlu2 %v357_v13, %s2002_s16 }
  0xf1   : > { %416 = vrot.lane.b32.xlu0 %v412_v16, %s2004_s26  ;;  %402 = vrot.lane.b32.xlu1 %v398_v17, %s2005_s29  ;;  %v2285_v16 = vld [vmem:[#allocation2 + $0x4] sm:$0xff]  ;;  %v645_v17 = vstv %s2273_s28  ;;  %s2356_s28 = sld [smem:[#allocation3 + $0x27]] }
  0xf2   : > { %388 = vrot.lane.b32.xlu2 %v384_v18, %s2003_s24  ;;  %v631_v18 = vstv %s2275_s5  ;;  %v646_v49 = vmul.f32 %v645_v17, %v2285_v16  ;;  %v647_v37 = vmul.f32 %v645_v17, %v2302_v31  ;;  %s2368_s5 = sld [smem:[#allocation3 + $0x29]] }
  0xf9   : > { %432 = vrot.lane.b32.xlu0 %v427_v20, %s2006_s3  ;;  %418 = vrot.lane.b32.xlu1 %v413_v21, %s2004_s26  ;;  %v632_v21 = vmul.f32 %v631_v18, %v2285_v16 }
  0xfa   : > { %404 = vrot.lane.b32.xlu2 %v399_v22, %s2005_s29 }
 0x101   : > { %466 = vrot.lane.b32.xlu0 %v462_v26, %s2001_s14  ;;  %452 = vrot.lane.b32.xlu1 %v448_v27, %s2002_s16 }
 0x102   : > { %430 = vrot.lane.b32.xlu2 %v426_v28, %s2006_s3 }
 0x109   : > { %482 = vrot.lane.b32.xlu0 %v477_v32, %s2003_s24  ;;  %468 = vrot.lane.b32.xlu1 %v463_v33, %s2001_s14  ;;  %v659_v32 = vstv %s2289_s17  ;;  %v349_v33 = vstv %s2291_s19  ;;  %s2377_s17 = sld [smem:[#allocation3 + $0x2c]] }
 0x10a   : > { %454 = vrot.lane.b32.xlu2 %v449_v34, %s2002_s16  ;;  %v661_v36 = vmul.f32 %v659_v32, %v2302_v31  ;;  %s2380_s19 = sld [smem:[#allocation3 + $0x2b]] }
 0x111   : > { %508 = vrot.lane.b32.xlu0 %v504_v38, %s2004_s26  ;;  %494 = vrot.lane.b32.xlu1 %v490_v39, %s2005_s29  ;;  %v350_v38 = vmul.f32 %v349_v33, %v2191_v3  ;;  %v351_v3 = vmul.f32 %v349_v33, %v2199_v9 }
 0x112   : > { %480 = vrot.lane.b32.xlu2 %v476_v40, %s2003_s24  ;;  %v633_v40 = vmul.f32 %v631_v18, %v2302_v31 }
 0x119   : > { %524 = vrot.lane.b32.xlu0 %v519_v42, %s2006_s3  ;;  %510 = vrot.lane.b32.xlu1 %v505_v43, %s2004_s26 }
 0x11a   : > { %496 = vrot.lane.b32.xlu2 %v491_v44, %s2005_s29 }
 0x11b   : > { %v269_v45 = vpop.permute.xlu2 %268 }
 0x11c   : > { %v274_v14 = vadd.f32 %v269_v45, %v258_v11 }
 0x121   : > { %558 = vrot.lane.b32.xlu0 %v554_v50, %s2001_s14  ;;  %544 = vrot.lane.b32.xlu1 %v540_v51, %s2002_s16  ;;  %v673_v50 = vstv %s2305_s30  ;;  %s2394_s30 = sld [smem:[#allocation3 + $0x15]] }
 0x122   : > { %522 = vrot.lane.b32.xlu2 %v518_v52, %s2006_s3  ;;  %v688_v52 = vmul.f32 %v687_v48, %v2285_v16 }
 0x124   : > { %v271_v55 = vpop.permute.xlu2 %270 }
 0x125   : > { %v275_v22 = vadd.f32 %v271_v55, %v259_v19  ;;  %v674_v55 = vmul.f32 %v673_v50, %v2285_v16 }
 0x129   : > { %574 = vrot.lane.b32.xlu0 %v569_v57, %s2003_s24  ;;  %560 = vrot.lane.b32.xlu1 %v555_v58, %s2001_s14  ;;  %v660_v57 = vmul.f32 %v659_v32, %v2285_v16 }
 0x12a   : > { %546 = vrot.lane.b32.xlu2 %v541_v59, %s2002_s16 }
 0x12c   : > { %v297_v60 = vpop.permute.xlu2 %296 }
 0x131   : > { %600 = vrot.lane.b32.xlu0 %v596_v63, %s2004_s26  ;;  %586 = vrot.lane.b32.xlu1 %v582_v0, %s2005_s29  ;;  %v675_v63 = vmul.f32 %v673_v50, %v2302_v31 }
 0x132   : > { %572 = vrot.lane.b32.xlu2 %v568_v1, %s2003_s24 }
 0x133   : > { %v283_v2 = vpop.permute.xlu0 %282 }
 0x134   : > { %v313_v4 = vpop.permute.xlu2 %312  ;;  %v288_v20 = vadd.f32 %v283_v2, %v274_v14 }
 0x136   : > { %v302_v25 = vadd.f32 %v297_v60, %v288_v20  ;;  %v701_v60 = vstv %s2317_s27  ;;  %s2402_s27 = sld [smem:[#allocation3 + $0x2f]] }
 0x137   : > { %v703_v61 = vmul.f32 %v701_v60, %v2302_v31 }
 0x139   : > { %616 = vrot.lane.b32.xlu0 %v611_v7, %s2006_s3  ;;  %602 = vrot.lane.b32.xlu1 %v597_v8, %s2004_s26  ;;  %v723_v7 = vstv %s2329_s7  ;;  %s2419_s7 = sld [smem:[#allocation3 + $0x30]] }
 0x13a   : > { %588 = vrot.lane.b32.xlu2 %v583_v10, %s2005_s29  ;;  %v738_v10 = vmul.f32 %v737_v6, %v2337_v5  ;;  %v724_v11 = vmul.f32 %v723_v7, %v2337_v5 }
 0x13b   : > { %v285_v12 = vpop.permute.xlu1 %284  ;;  %v299_v13 = vpop.permute.xlu0 %298 }
 0x13c   : > { %v339_v15 = vpop.permute.xlu2 %338  ;;  %v289_v26 = vadd.f32 %v285_v12, %v275_v22  ;;  %v441_v22 = vstv %s2343_s20  ;;  %s2431_s20 = sld [smem:[#allocation3 + $0x32]] }
 0x13e   : > { %v303_v34 = vadd.f32 %v299_v13, %v289_v26  ;;  %v702_v13 = vmul.f32 %v701_v60, %v2285_v16 }
 0x140   : > { %v317_v41 = vadd.f32 %v313_v4, %v303_v34 }
 0x141   : > { %650 = vrot.lane.b32.xlu0 %v646_v49, %s2001_s14  ;;  %636 = vrot.lane.b32.xlu1 %v632_v21, %s2002_s16  ;;  %v2353_v49 = vld [vmem:[#allocation2 + $0xd] sm:$0xff]  ;;  %v751_v21 = vstv %s2341_s8  ;;  %s2428_s8 = sld [smem:[#allocation3 + $0x33]] }
 0x142   : > { %614 = vrot.lane.b32.xlu2 %v610_v24, %s2006_s3  ;;  %v753_v26 = vmul.f32 %v751_v21, %v2353_v49 }
 0x143   : > { %v311_v27 = vpop.permute.xlu1 %310  ;;  %v325_v53 = vpop.permute.xlu0 %324 }
 0x144   : > { %v316_v28 = vadd.f32 %v311_v27, %v302_v25  ;;  %v363_v29 = vpop.permute.xlu2 %362  ;;  %v739_v27 = vmul.f32 %v737_v6, %v2353_v49 }
 0x146   : > { %v330_v35 = vadd.f32 %v325_v53, %v316_v28  ;;  %v442_v53 = vmul.f32 %v441_v22, %v2219_v23  ;;  %v443_v23 = vmul.f32 %v441_v22, %v2228_v30 }
 0x148   : > { %v344_v39 = vadd.f32 %v339_v15, %v330_v35 }
 0x149   : > { %666 = vrot.lane.b32.xlu0 %v661_v36, %s2003_s24  ;;  %652 = vrot.lane.b32.xlu1 %v647_v37, %s2001_s14 }
 0x14a   : > { %v352_v42 = vadd.f32 %v350_v38, %v344_v39  ;;  %638 = vrot.lane.b32.xlu2 %v633_v40, %s2002_s16  ;;  %v779_v38 = vstv %s2351_s23  ;;  %v765_v39 = vstv %s2356_s28  ;;  %s2443_s23 = sld [smem:[#allocation3 + $0x34]] }
 0x14b   : > { %v327_v43 = vpop.permute.xlu1 %326  ;;  %v341_v44 = vpop.permute.xlu0 %340  ;;  %s2445_s28 = sld [smem:[#allocation3 + $0x1c]] }
 0x14c   : > { %v331_v45 = vadd.f32 %v327_v43, %v317_v41  ;;  %v389_v47 = vpop.permute.xlu2 %388  ;;  %v780_v41 = vmul.f32 %v779_v38, %v2337_v5 }
 0x14e   : > { %v345_v51 = vadd.f32 %v341_v44, %v331_v45  ;;  %v752_v44 = vmul.f32 %v751_v21, %v2337_v5 }
 0x150   : > { %v353_v56 = vadd.f32 %v351_v3, %v345_v51  ;;  %v793_v3 = vstv %s2368_s5  ;;  %s2453_s5 = sld [smem:[#allocation3 + $0x36]] }
 0x151   : > { %692 = vrot.lane.b32.xlu0 %v688_v52, %s2004_s26  ;;  %678 = vrot.lane.b32.xlu1 %v674_v55, %s2005_s29  ;;  %v795_v52 = vmul.f32 %v793_v3, %v2353_v49  ;;  %v781_v55 = vmul.f32 %v779_v38, %v2353_v49  ;;  %v794_v6 = vmul.f32 %v793_v3, %v2337_v5  ;;  %v921_v3 = vstv %s2428_s8  ;;  %s2509_s8 = sld [smem:[#allocation3 + $0x3c]] }
 0x152   : > { %664 = vrot.lane.b32.xlu2 %v660_v57, %s2003_s24  ;;  %v367_v12 = vadd.f32 %v363_v29, %v353_v56  ;;  %v725_v29 = vmul.f32 %v723_v7, %v2353_v49  ;;  %v767_v57 = vmul.f32 %v765_v39, %v2353_v49 }
 0x153   : > { %v361_v58 = vpop.permute.xlu1 %360  ;;  %v375_v59 = vpop.permute.xlu0 %374 }
 0x154   : > { %v405_v9 = vpop.permute.xlu2 %404  ;;  %v366_v0 = vadd.f32 %v361_v58, %v352_v42  ;;  %v766_v42 = vmul.f32 %v765_v39, %v2337_v5 }
 0x156   : > { %v380_v8 = vadd.f32 %v375_v59, %v366_v0 }
 0x158   : > { %v394_v14 = vadd.f32 %v389_v47, %v380_v8 }
 0x159   : > { %708 = vrot.lane.b32.xlu0 %v703_v61, %s2006_s3  ;;  %694 = vrot.lane.b32.xlu1 %v689_v62, %s2004_s26  ;;  %v2388_v61 = vld [vmem:[#allocation2 + $0x6] sm:$0xff]  ;;  %v829_v62 = vstv %s2377_s17  ;;  %s2458_s17 = sld [smem:[#allocation3 + $0x35]] }
 0x15a   : > { %680 = vrot.lane.b32.xlu2 %v675_v63, %s2005_s29  ;;  %v815_v63 = vstv %s2380_s19  ;;  %s2470_s19 = sld [smem:[#allocation3 + $0x37]] }
 0x15b   : > { %v377_v1 = vpop.permute.xlu1 %376  ;;  %v391_v2 = vpop.permute.xlu0 %390 }
 0x15c   : > { %v431_v4 = vpop.permute.xlu2 %430  ;;  %v381_v15 = vadd.f32 %v377_v1, %v367_v12  ;;  %v830_v1 = vmul.f32 %v829_v62, %v2388_v61  ;;  %v2404_v12 = vld [vmem:[#allocation2 + $0xe] sm:$0xff] }
 0x15d   : > { %v817_v21 = vmul.f32 %v815_v63, %v2404_v12 }
 0x15e   : > { %v395_v24 = vadd.f32 %v391_v2, %v381_v15  ;;  %v816_v2 = vmul.f32 %v815_v63, %v2388_v61  ;;  %v2455_v63 = vld [vmem:[#allocation2 + $0x20] sm:$0xff] }
 0x160   : > { %v409_v32 = vadd.f32 %v405_v9, %v395_v24 }
 0x161   : > { %742 = vrot.lane.b32.xlu0 %v738_v10, %s2001_s14  ;;  %728 = vrot.lane.b32.xlu1 %v724_v11, %s2002_s16 }
 0x162   : > { %706 = vrot.lane.b32.xlu2 %v702_v13, %s2006_s3  ;;  %v843_v13 = vstv %s2392_s25  ;;  %s2479_s25 = sld [smem:[#allocation3 + $0x3a]] }
 0x163   : > { %v403_v17 = vpop.permute.xlu1 %402  ;;  %v417_v18 = vpop.permute.xlu0 %416 }
 0x164   : > { %v408_v19 = vadd.f32 %v403_v17, %v394_v14  ;;  %v455_v20 = vpop.permute.xlu2 %454  ;;  %v533_v14 = vstv %s2394_s30  ;;  %v845_v17 = vmul.f32 %v843_v13, %v2404_v12  ;;  %s2482_s30 = sld [smem:[#allocation3 + $0x39]] }
 0x166   : > { %v422_v25 = vadd.f32 %v417_v18, %v408_v19  ;;  %v831_v18 = vmul.f32 %v829_v62, %v2404_v12  ;;  %v534_v19 = vmul.f32 %v533_v14, %v2249_v46  ;;  %v535_v46 = vmul.f32 %v533_v14, %v2257_v54 }
 0x168   : > { %v436_v28 = vadd.f32 %v431_v4, %v422_v25 }
 0x169   : > { %758 = vrot.lane.b32.xlu0 %v753_v26, %s2003_s24  ;;  %744 = vrot.lane.b32.xlu1 %v739_v27, %s2001_s14 }
 0x16a   : > { %v444_v33 = vadd.f32 %v442_v53, %v436_v28  ;;  %730 = vrot.lane.b32.xlu2 %v725_v29, %s2002_s16  ;;  %v871_v53 = vstv %s2402_s27  ;;  %v857_v28 = vstv %s2407_s6  ;;  %s2494_s27 = sld [smem:[#allocation3 + $0x3b]] }
 0x16b   : > { %v419_v34 = vpop.permute.xlu1 %418  ;;  %v433_v35 = vpop.permute.xlu0 %432  ;;  %s2496_s6 = sld [smem:[#allocation3 + $0x23]] }
 0x16c   : > { %v423_v36 = vadd.f32 %v419_v34, %v409_v32  ;;  %v481_v37 = vpop.permute.xlu2 %480  ;;  %v872_v32 = vmul.f32 %v871_v53, %v2388_v61 }
 0x16e   : > { %v437_v40 = vadd.f32 %v433_v35, %v423_v36  ;;  %v844_v35 = vmul.f32 %v843_v13, %v2388_v61 }
 0x170   : > { %v445_v43 = vadd.f32 %v443_v23, %v437_v40  ;;  %v885_v23 = vstv %s2419_s7  ;;  %s2504_s7 = sld [smem:[#allocation3 + $0x3d]] }
 0x171   : > { %784 = vrot.lane.b32.xlu0 %v780_v41, %s2004_s26  ;;  %770 = vrot.lane.b32.xlu1 %v766_v42, %s2005_s29  ;;  %v887_v41 = vmul.f32 %v885_v23, %v2404_v12  ;;  %v873_v42 = vmul.f32 %v871_v53, %v2404_v12 }
 0x172   : > { %v459_v45 = vadd.f32 %v455_v20, %v445_v43  ;;  %756 = vrot.lane.b32.xlu2 %v752_v44, %s2003_s24  ;;  %v859_v44 = vmul.f32 %v857_v28, %v2404_v12 }
 0x173   : > { %v453_v47 = vpop.permute.xlu1 %452  ;;  %v467_v48 = vpop.permute.xlu0 %466 }
 0x174   : > { %v458_v30 = vadd.f32 %v453_v47, %v444_v33  ;;  %v497_v50 = vpop.permute.xlu2 %496  ;;  %v858_v33 = vmul.f32 %v857_v28, %v2388_v61 }
 0x176   : > { %v472_v51 = vadd.f32 %v467_v48, %v458_v30 }
 0x178   : > { %v486_v56 = vadd.f32 %v481_v37, %v472_v51  ;;  %v907_v51 = vstv %s2431_s20  ;;  %s2521_s20 = sld [smem:[#allocation3 + $0x3e]] }
 0x179   : > { %800 = vrot.lane.b32.xlu0 %v795_v52, %s2006_s3  ;;  %786 = vrot.lane.b32.xlu1 %v781_v55, %s2004_s26 }
 0x17a   : > { %772 = vrot.lane.b32.xlu2 %v767_v57, %s2005_s29 }
 0x17b   : > { %v469_v58 = vpop.permute.xlu1 %468  ;;  %v483_v59 = vpop.permute.xlu0 %482 }
 0x17c   : > { %v473_v9 = vadd.f32 %v469_v58, %v459_v45  ;;  %v523_v60 = vpop.permute.xlu2 %522  ;;  %v886_v58 = vmul.f32 %v885_v23, %v2388_v61  ;;  %v1013_v23 = vstv %s2479_s25  ;;  %s2560_s25 = sld [smem:[#allocation3 + $0x43]] }
 0x17e   : > { %v487_v0 = vadd.f32 %v483_v59, %v473_v9 }
 0x180   : > { %v501_v4 = vadd.f32 %v497_v50, %v487_v0  ;;  %v2439_v50 = vld [vmem:[#allocation2 + $0x18] sm:$0xff]  ;;  %v935_v0 = vstv %s2443_s23  ;;  %s2530_s23 = sld [smem:[#allocation3 + $0x41]] }
 0x181   : > { %834 = vrot.lane.b32.xlu0 %v830_v1, %s2001_s14  ;;  %820 = vrot.lane.b32.xlu1 %v816_v2, %s2002_s16  ;;  %v922_v55 = vmul.f32 %v921_v3, %v2439_v50  ;;  %v625_v1 = vstv %s2445_s28  ;;  %s2533_s28 = sld [smem:[#allocation3 + $0x40]] }
 0x182   : > { %798 = vrot.lane.b32.xlu2 %v794_v6, %s2006_s3  ;;  %v923_v6 = vmul.f32 %v921_v3, %v2455_v63 }
 0x183   : > { %v495_v7 = vpop.permute.xlu1 %494  ;;  %v509_v8 = vpop.permute.xlu0 %508 }
 0x184   : > { %v500_v10 = vadd.f32 %v495_v7, %v486_v56  ;;  %v547_v11 = vpop.permute.xlu2 %546  ;;  %v908_v56 = vmul.f32 %v907_v51, %v2439_v50  ;;  %v626_v7 = vmul.f32 %v625_v1, %v2285_v16  ;;  %v627_v16 = vmul.f32 %v625_v1, %v2302_v31 }
 0x186   : > { %v514_v15 = vadd.f32 %v509_v8, %v500_v10  ;;  %v909_v10 = vmul.f32 %v907_v51, %v2455_v63  ;;  %v2506_v51 = vld [vmem:[#allocation2 + $0x21] sm:$0xff] }
 0x188   : > { %v528_v20 = vadd.f32 %v523_v60, %v514_v15 }
 0x189   : > { %850 = vrot.lane.b32.xlu0 %v845_v17, %s2003_s24  ;;  %836 = vrot.lane.b32.xlu1 %v831_v18, %s2001_s14  ;;  %v963_v18 = vstv %s2453_s5  ;;  %s2545_s5 = sld [smem:[#allocation3 + $0x42]] }
 0x18a   : > { %v536_v22 = vadd.f32 %v534_v19, %v528_v20  ;;  %822 = vrot.lane.b32.xlu2 %v817_v21, %s2002_s16  ;;  %v949_v19 = vstv %s2458_s17  ;;  %v964_v21 = vmul.f32 %v963_v18, %v2439_v50  ;;  %s2547_s17 = sld [smem:[#allocation3 + $0x2a]] }
 0x18b   : > { %v511_v24 = vpop.permute.xlu1 %510  ;;  %v525_v25 = vpop.permute.xlu0 %524 }
 0x18c   : > { %v515_v26 = vadd.f32 %v511_v24, %v501_v4  ;;  %v573_v27 = vpop.permute.xlu2 %572  ;;  %v937_v4 = vmul.f32 %v935_v0, %v2455_v63 }
 0x18e   : > { %v529_v29 = vadd.f32 %v525_v25, %v515_v26  ;;  %v936_v25 = vmul.f32 %v935_v0, %v2439_v50 }
 0x190   : > { %v537_v34 = vadd.f32 %v535_v46, %v529_v29  ;;  %v977_v46 = vstv %s2470_s19  ;;  %s2555_s19 = sld [smem:[#allocation3 + $0x44]] }
 0x191   : > { %876 = vrot.lane.b32.xlu0 %v872_v32, %s2004_s26  ;;  %862 = vrot.lane.b32.xlu1 %v858_v33, %s2005_s29  ;;  %v979_v32 = vmul.f32 %v977_v46, %v2455_v63  ;;  %v965_v33 = vmul.f32 %v963_v18, %v2455_v63 }
 0x192   : > { %v551_v36 = vadd.f32 %v547_v11, %v537_v34  ;;  %848 = vrot.lane.b32.xlu2 %v844_v35, %s2003_s24  ;;  %v951_v35 = vmul.f32 %v949_v19, %v2455_v63 }
 0x193   : > { %v545_v37 = vpop.permute.xlu1 %544  ;;  %v559_v38 = vpop.permute.xlu0 %558 }
 0x194   : > { %v550_v54 = vadd.f32 %v545_v37, %v536_v22  ;;  %v589_v39 = vpop.permute.xlu2 %588  ;;  %v950_v22 = vmul.f32 %v949_v19, %v2439_v50 }
 0x196   : > { %v564_v40 = vadd.f32 %v559_v38, %v550_v54 }
 0x198   : > { %v578_v43 = vadd.f32 %v573_v27, %v564_v40  ;;  %v999_v40 = vstv %s2482_s30  ;;  %s2572_s30 = sld [smem:[#allocation3 + $0x45]] }
 0x199   : > { %892 = vrot.lane.b32.xlu0 %v887_v41, %s2006_s3  ;;  %878 = vrot.lane.b32.xlu1 %v873_v42, %s2004_s26 }
 0x19a   : > { %864 = vrot.lane.b32.xlu2 %v859_v44, %s2005_s29 }
 0x19b   : > { %v561_v45 = vpop.permute.xlu1 %560  ;;  %v575_v47 = vpop.permute.xlu0 %574 }
 0x19c   : > { %v565_v48 = vadd.f32 %v561_v45, %v551_v36  ;;  %v615_v30 = vpop.permute.xlu2 %614  ;;  %v978_v45 = vmul.f32 %v977_v46, %v2439_v50  ;;  %v1105_v46 = vstv %s2530_s23  ;;  %s2610_s23 = sld [smem:[#allocation3 + $0x4a]] }
 0x19e   : > { %v579_v52 = vadd.f32 %v575_v47, %v565_v48 }
 0x1a0   : > { %v593_v57 = vadd.f32 %v589_v39, %v579_v52  ;;  %v2490_v39 = vld [vmem:[#allocation2 + $0x19] sm:$0xff]  ;;  %v1027_v52 = vstv %s2494_s27  ;;  %s2581_s27 = sld [smem:[#allocation3 + $0x48]] }
 0x1a1   : > { %926 = vrot.lane.b32.xlu0 %v922_v55, %s2001_s14  ;;  %912 = vrot.lane.b32.xlu1 %v908_v56, %s2002_s16  ;;  %v1014_v42 = vmul.f32 %v1013_v23, %v2490_v39  ;;  %v717_v55 = vstv %s2496_s6  ;;  %s2584_s6 = sld [smem:[#allocation3 + $0x47]] }
 0x1a2   : > { %890 = vrot.lane.b32.xlu2 %v886_v58, %s2006_s3  ;;  %v1015_v58 = vmul.f32 %v1013_v23, %v2506_v51 }
 0x1a3   : > { %v587_v59 = vpop.permute.xlu1 %586  ;;  %v601_v9 = vpop.permute.xlu0 %600 }
 0x1a4   : > { %v592_v60 = vadd.f32 %v587_v59, %v578_v43  ;;  %v639_v62 = vpop.permute.xlu2 %638  ;;  %v1000_v43 = vmul.f32 %v999_v40, %v2490_v39  ;;  %v718_v59 = vmul.f32 %v717_v55, %v2337_v5  ;;  %v719_v5 = vmul.f32 %v717_v55, %v2353_v49 }
 0x1a6   : > { %v606_v2 = vadd.f32 %v601_v9, %v592_v60  ;;  %v1001_v60 = vmul.f32 %v999_v40, %v2506_v51  ;;  %v2557_v40 = vld [vmem:[#allocation2 + $0x22] sm:$0xff] }
 0x1a8   : > { %v620_v8 = vadd.f32 %v615_v30, %v606_v2 }
 0x1a9   : > { %942 = vrot.lane.b32.xlu0 %v937_v4, %s2003_s24  ;;  %928 = vrot.lane.b32.xlu1 %v923_v6, %s2001_s14  ;;  %v1055_v6 = vstv %s2504_s7  ;;  %s2596_s7 = sld [smem:[#allocation3 + $0x31]] }
 0x1aa   : > { %v628_v11 = vadd.f32 %v626_v7, %v620_v8  ;;  %914 = vrot.lane.b32.xlu2 %v909_v10, %s2002_s16  ;;  %v1041_v7 = vstv %s2509_s8  ;;  %v1056_v10 = vmul.f32 %v1055_v6, %v2490_v39  ;;  %s2598_s8 = sld [smem:[#allocation3 + $0x49]] }
 0x1ab   : > { %v603_v13 = vpop.permute.xlu1 %602  ;;  %v617_v14 = vpop.permute.xlu0 %616 }
 0x1ac   : > { %v607_v15 = vadd.f32 %v603_v13, %v593_v57  ;;  %v665_v17 = vpop.permute.xlu2 %664  ;;  %v1029_v57 = vmul.f32 %v1027_v52, %v2506_v51 }
 0x1ae   : > { %v621_v20 = vadd.f32 %v617_v14, %v607_v15  ;;  %v1028_v14 = vmul.f32 %v1027_v52, %v2490_v39 }
 0x1b0   : > { %v629_v24 = vadd.f32 %v627_v16, %v621_v20  ;;  %v1069_v16 = vstv %s2521_s20  ;;  %s2606_s20 = sld [smem:[#allocation3 + $0x4b]] }
 0x1b1   : > { %968 = vrot.lane.b32.xlu0 %v964_v21, %s2004_s26  ;;  %954 = vrot.lane.b32.xlu1 %v950_v22, %s2005_s29  ;;  %v1071_v21 = vmul.f32 %v1069_v16, %v2506_v51  ;;  %v1057_v22 = vmul.f32 %v1055_v6, %v2506_v51 }
 0x1b2   : > { %v643_v26 = vadd.f32 %v639_v62, %v629_v24  ;;  %940 = vrot.lane.b32.xlu2 %v936_v25, %s2003_s24  ;;  %v1043_v25 = vmul.f32 %v1041_v7, %v2506_v51 }
 0x1b3   : > { %v637_v27 = vpop.permute.xlu1 %636  ;;  %v651_v53 = vpop.permute.xlu0 %650 }
 0x1b4   : > { %v642_v31 = vadd.f32 %v637_v27, %v628_v11  ;;  %v681_v28 = vpop.permute.xlu2 %680  ;;  %v1042_v11 = vmul.f32 %v1041_v7, %v2490_v39 }
 0x1b6   : > { %v656_v29 = vadd.f32 %v651_v53, %v642_v31 }
 0x1b8   : > { %v670_v34 = vadd.f32 %v665_v17, %v656_v29  ;;  %v1091_v29 = vstv %s2533_s28  ;;  %s2624_s28 = sld [smem:[#allocation3 + $0x4c]] }
 0x1b9   : > { %984 = vrot.lane.b32.xlu0 %v979_v32, %s2006_s3  ;;  %970 = vrot.lane.b32.xlu1 %v965_v33, %s2004_s26 }
 0x1ba   : > { %956 = vrot.lane.b32.xlu2 %v951_v35, %s2005_s29 }
 0x1bb   : > { %v653_v36 = vpop.permute.xlu1 %652  ;;  %v667_v37 = vpop.permute.xlu0 %666 }
 0x1bc   : > { %v657_v38 = vadd.f32 %v653_v36, %v643_v26  ;;  %v707_v54 = vpop.permute.xlu2 %706  ;;  %v1070_v36 = vmul.f32 %v1069_v16, %v2490_v39  ;;  %v1197_v16 = vstv %s2581_s27  ;;  %s2661_s27 = sld [smem:[#allocation3 + $0x51]] }
 0x1be   : > { %v671_v41 = vadd.f32 %v667_v37, %v657_v38 }
 0x1c0   : > { %v685_v44 = vadd.f32 %v681_v28, %v671_v41  ;;  %v2541_v28 = vld [vmem:[#allocation2 + $0x1a] sm:$0xff]  ;;  %v1119_v41 = vstv %s2545_s5  ;;  %s2632_s5 = sld [smem:[#allocation3 + $0x4f]] }
 0x1c1   : > { %1018 = vrot.lane.b32.xlu0 %v1014_v42, %s2001_s14  ;;  %1004 = vrot.lane.b32.xlu1 %v1000_v43, %s2002_s16  ;;  %v1106_v33 = vmul.f32 %v1105_v46, %v2541_v28  ;;  %v809_v42 = vstv %s2547_s17  ;;  %s2634_s17 = sld [smem:[#allocation3 + $0x4e]] }
 0x1c2   : > { %982 = vrot.lane.b32.xlu2 %v978_v45, %s2006_s3  ;;  %v1107_v45 = vmul.f32 %v1105_v46, %v2557_v40 }
 0x1c3   : > { %v679_v47 = vpop.permute.xlu1 %678  ;;  %v693_v48 = vpop.permute.xlu0 %692 }
 0x1c4   : > { %v684_v30 = vadd.f32 %v679_v47, %v670_v34  ;;  %v731_v3 = vpop.permute.xlu2 %730  ;;  %v1092_v34 = vmul.f32 %v1091_v29, %v2541_v28  ;;  %v810_v47 = vmul.f32 %v809_v42, %v2388_v61  ;;  %v811_v61 = vmul.f32 %v809_v42, %v2404_v12 }
 0x1c6   : > { %v698_v56 = vadd.f32 %v693_v48, %v684_v30  ;;  %v1093_v30 = vmul.f32 %v1091_v29, %v2557_v40  ;;  %v2608_v29 = vld [vmem:[#allocation2 + $0x23] sm:$0xff] }
 0x1c8   : > { %v712_v9 = vadd.f32 %v707_v54, %v698_v56 }
 0x1c9   : > { %1034 = vrot.lane.b32.xlu0 %v1029_v57, %s2003_s24  ;;  %1020 = vrot.lane.b32.xlu1 %v1015_v58, %s2001_s14  ;;  %v1147_v58 = vstv %s2555_s19  ;;  %s2647_s19 = sld [smem:[#allocation3 + $0x38]] }
 0x1ca   : > { %v720_v62 = vadd.f32 %v718_v59, %v712_v9  ;;  %1006 = vrot.lane.b32.xlu2 %v1001_v60, %s2002_s16  ;;  %v1133_v59 = vstv %s2560_s25  ;;  %v1148_v60 = vmul.f32 %v1147_v58, %v2541_v28  ;;  %s2649_s25 = sld [smem:[#allocation3 + $0x50]] }
 0x1cb   : > { %v695_v0 = vpop.permute.xlu1 %694  ;;  %v709_v1 = vpop.permute.xlu0 %708 }
 0x1cc   : > { %v699_v2 = vadd.f32 %v695_v0, %v685_v44  ;;  %v757_v4 = vpop.permute.xlu2 %756  ;;  %v1121_v44 = vmul.f32 %v1119_v41, %v2557_v40 }
 0x1ce   : > { %v713_v8 = vadd.f32 %v709_v1, %v699_v2  ;;  %v1120_v1 = vmul.f32 %v1119_v41, %v2541_v28 }
 0x1d0   : > { %v721_v13 = vadd.f32 %v719_v5, %v713_v8  ;;  %v1161_v5 = vstv %s2572_s30  ;;  %s2657_s30 = sld [smem:[#allocation3 + $0x52]] }
 0x1d1   : > { %1060 = vrot.lane.b32.xlu0 %v1056_v10, %s2004_s26  ;;  %1046 = vrot.lane.b32.xlu1 %v1042_v11, %s2005_s29  ;;  %v1163_v10 = vmul.f32 %v1161_v5, %v2557_v40  ;;  %v1149_v11 = vmul.f32 %v1147_v58, %v2557_v40 }
 0x1d2   : > { %v735_v15 = vadd.f32 %v731_v3, %v721_v13  ;;  %1032 = vrot.lane.b32.xlu2 %v1028_v14, %s2003_s24  ;;  %v1135_v14 = vmul.f32 %v1133_v59, %v2557_v40 }
 0x1d3   : > { %v729_v17 = vpop.permute.xlu1 %728  ;;  %v743_v18 = vpop.permute.xlu0 %742 }
 0x1d4   : > { %v734_v49 = vadd.f32 %v729_v17, %v720_v62  ;;  %v773_v19 = vpop.permute.xlu2 %772  ;;  %v1134_v62 = vmul.f32 %v1133_v59, %v2541_v28 }
 0x1d6   : > { %v748_v20 = vadd.f32 %v743_v18, %v734_v49 }
 0x1d8   : > { %v762_v24 = vadd.f32 %v757_v4, %v748_v20  ;;  %v1183_v20 = vstv %s2584_s6  ;;  %s2675_s6 = sld [smem:[#allocation3 + $0x53]] }
 0x1d9   : > { %1076 = vrot.lane.b32.xlu0 %v1071_v21, %s2006_s3  ;;  %1062 = vrot.lane.b32.xlu1 %v1057_v22, %s2004_s26 }
 0x1da   : > { %1048 = vrot.lane.b32.xlu2 %v1043_v25, %s2005_s29 }
 0x1db   : > { %v745_v26 = vpop.permute.xlu1 %744  ;;  %v759_v27 = vpop.permute.xlu0 %758 }
 0x1dc   : > { %v749_v53 = vadd.f32 %v745_v26, %v735_v15  ;;  %v799_v31 = vpop.permute.xlu2 %798  ;;  %v1162_v26 = vmul.f32 %v1161_v5, %v2541_v28  ;;  %v1289_v5 = vstv %s2632_s5  ;;  %s2712_s5 = sld [smem:[#allocation3 + $0x59]] }
 0x1de   : > { %v763_v32 = vadd.f32 %v759_v27, %v749_v53 }
 0x1e0   : > { %v777_v35 = vadd.f32 %v773_v19, %v763_v32  ;;  %v2592_v19 = vld [vmem:[#allocation2 + $0x1b] sm:$0xff]  ;;  %v901_v32 = vstv %s2596_s7  ;;  %s2683_s7 = sld [smem:[#allocation3 + $0x56]] }
 0x1e1   : > { %1110 = vrot.lane.b32.xlu0 %v1106_v33, %s2001_s14  ;;  %1096 = vrot.lane.b32.xlu1 %v1092_v34, %s2002_s16  ;;  %v1198_v22 = vmul.f32 %v1197_v16, %v2592_v19  ;;  %v1211_v34 = vstv %s2598_s8  ;;  %s2685_s8 = sld [smem:[#allocation3 + $0x55]] }
 0x1e2   : > { %1074 = vrot.lane.b32.xlu2 %v1070_v36, %s2006_s3  ;;  %v1199_v36 = vmul.f32 %v1197_v16, %v2608_v29 }
 0x1e3   : > { %v771_v37 = vpop.permute.xlu1 %770  ;;  %v785_v38 = vpop.permute.xlu0 %784 }
 0x1e4   : > { %v776_v54 = vadd.f32 %v771_v37, %v762_v24  ;;  %v823_v23 = vpop.permute.xlu2 %822  ;;  %v1184_v24 = vmul.f32 %v1183_v20, %v2592_v19 }
 0x1e6   : > { %v790_v43 = vadd.f32 %v785_v38, %v776_v54  ;;  %v1185_v38 = vmul.f32 %v1183_v20, %v2608_v29  ;;  %v902_v54 = vmul.f32 %v901_v32, %v2439_v50  ;;  %v2659_v20 = vld [vmem:[#allocation2 + $0x24] sm:$0xff] }
 0x1e8   : > { %v804_v48 = vadd.f32 %v799_v31, %v790_v43 }
 0x1e9   : > { %1126 = vrot.lane.b32.xlu0 %v1121_v44, %s2003_s24  ;;  %1112 = vrot.lane.b32.xlu1 %v1107_v45, %s2001_s14  ;;  %v1239_v45 = vstv %s2606_s20  ;;  %s2698_s20 = sld [smem:[#allocation3 + $0x3f]] }
 0x1ea   : > { %v812_v3 = vadd.f32 %v810_v47, %v804_v48  ;;  %1098 = vrot.lane.b32.xlu2 %v1093_v30, %s2002_s16  ;;  %v1225_v47 = vstv %s2610_s23  ;;  %v903_v48 = vmul.f32 %v901_v32, %v2455_v63  ;;  %v1240_v50 = vmul.f32 %v1239_v45, %v2592_v19  ;;  %s2700_s23 = sld [smem:[#allocation3 + $0x57]] }
 0x1eb   : > { %v787_v52 = vpop.permute.xlu1 %786  ;;  %v801_v55 = vpop.permute.xlu0 %800 }
 0x1ec   : > { %v791_v56 = vadd.f32 %v787_v52, %v777_v35  ;;  %v849_v57 = vpop.permute.xlu2 %848  ;;  %v1213_v35 = vmul.f32 %v1211_v34, %v2608_v29 }
 0x1ee   : > { %v805_v9 = vadd.f32 %v801_v55, %v791_v56  ;;  %v1212_v55 = vmul.f32 %v1211_v34, %v2592_v19 }
 0x1f0   : > { %v813_v0 = vadd.f32 %v811_v61, %v805_v9  ;;  %v1253_v9 = vstv %s2624_s28  ;;  %s2708_s28 = sld [smem:[#allocation3 + $0x58]] }
 0x1f1   : > { %1152 = vrot.lane.b32.xlu0 %v1148_v60, %s2004_s26  ;;  %1138 = vrot.lane.b32.xlu1 %v1134_v62, %s2005_s29  ;;  %v1255_v60 = vmul.f32 %v1253_v9, %v2608_v29  ;;  %v1241_v62 = vmul.f32 %v1239_v45, %v2608_v29 }
 0x1f2   : > { %v827_v2 = vadd.f32 %v823_v23, %v813_v0  ;;  %1124 = vrot.lane.b32.xlu2 %v1120_v1, %s2003_s24  ;;  %v1227_v0 = vmul.f32 %v1225_v47, %v2608_v29 }
 0x1f3   : > { %v821_v4 = vpop.permute.xlu1 %820  ;;  %v835_v6 = vpop.permute.xlu0 %834 }
 0x1f4   : > { %v826_v12 = vadd.f32 %v821_v4, %v812_v3  ;;  %v865_v7 = vpop.permute.xlu2 %864  ;;  %v1226_v3 = vmul.f32 %v1225_v47, %v2592_v19 }
 0x1f6   : > { %v840_v8 = vadd.f32 %v835_v6, %v826_v12 }
 0x1f8   : > { %v854_v13 = vadd.f32 %v849_v57, %v840_v8  ;;  %v1275_v8 = vstv %s2634_s17  ;;  %s2726_s17 = sld [smem:[#allocation3 + $0x5a]] }
 0x1f9   : > { %1168 = vrot.lane.b32.xlu0 %v1163_v10, %s2006_s3  ;;  %1154 = vrot.lane.b32.xlu1 %v1149_v11, %s2004_s26 }
 0x1fa   : > { %1140 = vrot.lane.b32.xlu2 %v1135_v14, %s2005_s29  ;;  %v1254_v14 = vmul.f32 %v1253_v9, %v2592_v19  ;;  %v1367_v9 = vstv %s2685_s8  ;;  %s1790_s8 = sld [smem:[#allocation3 + $0x61]] }
 0x1fb   : > { %v837_v15 = vpop.permute.xlu1 %836  ;;  %v851_v17 = vpop.permute.xlu0 %850 }
 0x1fc   : > { %v841_v18 = vadd.f32 %v837_v15, %v827_v2  ;;  %v891_v49 = vpop.permute.xlu2 %890 }
 0x1fe   : > { %v855_v21 = vadd.f32 %v851_v17, %v841_v18 }
 0x200   : > { %v869_v25 = vadd.f32 %v865_v7, %v855_v21  ;;  %v2643_v7 = vld [vmem:[#allocation2 + $0x1c] sm:$0xff]  ;;  %v993_v21 = vstv %s2647_s19  ;;  %s2734_s19 = sld [smem:[#allocation3 + $0x5c]] }
 0x201   : > { %1202 = vrot.lane.b32.xlu0 %v1198_v22, %s2001_s14  ;;  %1188 = vrot.lane.b32.xlu1 %v1184_v24, %s2002_s16  ;;  %v1290_v11 = vmul.f32 %v1289_v5, %v2643_v7  ;;  %v1303_v24 = vstv %s2649_s25  ;;  %s2736_s25 = sld [smem:[#allocation3 + $0x5d]] }
 0x202   : > { %1166 = vrot.lane.b32.xlu2 %v1162_v26, %s2006_s3  ;;  %v1291_v26 = vmul.f32 %v1289_v5, %v2659_v20 }
 0x203   : > { %v863_v27 = vpop.permute.xlu1 %862  ;;  %v877_v53 = vpop.permute.xlu0 %876 }
 0x204   : > { %v868_v31 = vadd.f32 %v863_v27, %v854_v13  ;;  %v915_v46 = vpop.permute.xlu2 %914  ;;  %v1276_v13 = vmul.f32 %v1275_v8, %v2643_v7 }
 0x206   : > { %v882_v33 = vadd.f32 %v877_v53, %v868_v31  ;;  %v1277_v53 = vmul.f32 %v1275_v8, %v2659_v20  ;;  %v994_v31 = vmul.f32 %v993_v21, %v2490_v39  ;;  %v2710_v8 = vld [vmem:[#allocation2 + $0x25] sm:$0xff] }
 0x208   : > { %v896_v37 = vadd.f32 %v891_v49, %v882_v33 }
 0x209   : > { %1218 = vrot.lane.b32.xlu0 %v1213_v35, %s2003_s24  ;;  %1204 = vrot.lane.b32.xlu1 %v1199_v36, %s2001_s14  ;;  %v1331_v36 = vstv %s2657_s30  ;;  %s2749_s30 = sld [smem:[#allocation3 + $0x46]] }
 0x20a   : > { %1190 = vrot.lane.b32.xlu2 %v1185_v38, %s2002_s16  ;;  %v904_v23 = vadd.f32 %v902_v54, %v896_v37  ;;  %v1317_v37 = vstv %s2661_s27  ;;  %v995_v38 = vmul.f32 %v993_v21, %v2506_v51  ;;  %v1332_v39 = vmul.f32 %v1331_v36, %v2643_v7  ;;  %s2751_s27 = sld [smem:[#allocation3 + $0x5e]] }
 0x20b   : > { %v879_v41 = vpop.permute.xlu1 %878  ;;  %v893_v42 = vpop.permute.xlu0 %892 }
 0x20c   : > { %v883_v43 = vadd.f32 %v879_v41, %v869_v25  ;;  %v941_v44 = vpop.permute.xlu2 %940  ;;  %v1305_v25 = vmul.f32 %v1303_v24, %v2659_v20 }
 0x20e   : > { %v897_v30 = vadd.f32 %v893_v42, %v883_v43  ;;  %v1304_v42 = vmul.f32 %v1303_v24, %v2643_v7 }
 0x210   : > { %v905_v52 = vadd.f32 %v903_v48, %v897_v30  ;;  %v1345_v30 = vstv %s2675_s6  ;;  %s2759_s6 = sld [smem:[#allocation3 + $0x5f]] }
 0x211   : > { %1244 = vrot.lane.b32.xlu0 %v1240_v50, %s2004_s26  ;;  %1230 = vrot.lane.b32.xlu1 %v1226_v3, %s2005_s29  ;;  %v1347_v50 = vmul.f32 %v1345_v30, %v2659_v20  ;;  %v1333_v3 = vmul.f32 %v1331_v36, %v2659_v20 }
 0x212   : > { %1216 = vrot.lane.b32.xlu2 %v1212_v55, %s2003_s24  ;;  %v919_v56 = vadd.f32 %v915_v46, %v905_v52  ;;  %v1319_v52 = vmul.f32 %v1317_v37, %v2659_v20 }
 0x213   : > { %v913_v57 = vpop.permute.xlu1 %912  ;;  %v927_v63 = vpop.permute.xlu0 %926 }
 0x214   : > { %v918_v58 = vadd.f32 %v913_v57, %v904_v23  ;;  %v957_v59 = vpop.permute.xlu2 %956  ;;  %v1318_v23 = vmul.f32 %v1317_v37, %v2643_v7 }
 0x216   : > { %v932_v61 = vadd.f32 %v927_v63, %v918_v58 }
 0x218   : > { %v946_v1 = vadd.f32 %v941_v44, %v932_v61  ;;  %v1381_v61 = vstv %s2683_s7  ;;  %s2763_s7 = sld [smem:[#allocation3 + $0x60]] }
 0x219   : > { %1260 = vrot.lane.b32.xlu0 %v1255_v60, %s2006_s3  ;;  %1246 = vrot.lane.b32.xlu1 %v1241_v62, %s2004_s26 }
 0x21a   : > { %1232 = vrot.lane.b32.xlu2 %v1227_v0, %s2005_s29 }
 0x21b   : > { %v929_v2 = vpop.permute.xlu1 %928  ;;  %v943_v4 = vpop.permute.xlu0 %942 }
 0x21c   : > { %v933_v6 = vadd.f32 %v929_v2, %v919_v56  ;;  %v983_v12 = vpop.permute.xlu2 %982 }
 0x21e   : > { %v947_v10 = vadd.f32 %v943_v4, %v933_v6 }
 0x220   : > { %v961_v15 = vadd.f32 %v957_v59, %v947_v10  ;;  %v2694_v59 = vld [vmem:[#allocation2 + $0x1d] sm:$0xff]  ;;  %v1085_v10 = vstv %s2698_s20 }
 0x221   : > { %1294 = vrot.lane.b32.xlu0 %v1290_v11, %s2001_s14  ;;  %1280 = vrot.lane.b32.xlu1 %v1276_v13, %s2002_s16  ;;  %v1382_v62 = vmul.f32 %v1381_v61, %v2694_v59  ;;  %v1368_v0 = vmul.f32 %v1367_v9, %v2694_v59  ;;  %v1395_v13 = vstv %s2700_s23 }
 0x222   : > { %1258 = vrot.lane.b32.xlu2 %v1254_v14, %s2006_s3  ;;  %v1383_v14 = vmul.f32 %v1381_v61, %v2710_v8 }
 0x223   : > { %v955_v17 = vpop.permute.xlu1 %954  ;;  %v969_v18 = vpop.permute.xlu0 %968 }
 0x224   : > { %v960_v49 = vadd.f32 %v955_v17, %v946_v1  ;;  %v1007_v16 = vpop.permute.xlu2 %1006  ;;  %v1346_v1 = vmul.f32 %v1345_v30, %v2643_v7  ;;  %v1473_v30 = vstv %s2736_s25 }
 0x226   : > { %v974_v22 = vadd.f32 %v969_v18, %v960_v49  ;;  %v1369_v18 = vmul.f32 %v1367_v9, %v2710_v8  ;;  %v1086_v49 = vmul.f32 %v1085_v10, %v2541_v28  ;;  %v2761_v9 = vld [vmem:[#allocation2 + $0x26] sm:$0xff] }
 0x228   : > { %v988_v27 = vadd.f32 %v983_v12, %v974_v22 }
 0x229   : > { %1310 = vrot.lane.b32.xlu0 %v1305_v25, %s2003_s24  ;;  %1296 = vrot.lane.b32.xlu1 %v1291_v26, %s2001_s14  ;;  %v1409_v26 = vstv %s2708_s28 }
 0x22a   : > { %1282 = vrot.lane.b32.xlu2 %v1277_v53, %s2002_s16  ;;  %v996_v46 = vadd.f32 %v994_v31, %v988_v27  ;;  %v1423_v27 = vstv %s2712_s5  ;;  %v1087_v53 = vmul.f32 %v1085_v10, %v2557_v40  ;;  %v1410_v28 = vmul.f32 %v1409_v26, %v2694_v59 }
 0x22b   : > { %v971_v32 = vpop.permute.xlu1 %970  ;;  %v985_v33 = vpop.permute.xlu0 %984 }
 0x22c   : > { %v975_v34 = vadd.f32 %v971_v32, %v961_v15  ;;  %v1033_v35 = vpop.permute.xlu2 %1032  ;;  %v1397_v15 = vmul.f32 %v1395_v13, %v2710_v8 }
 0x22e   : > { %v989_v54 = vadd.f32 %v985_v33, %v975_v34  ;;  %v1396_v33 = vmul.f32 %v1395_v13, %v2694_v59 }
 0x230   : > { %v997_v41 = vadd.f32 %v995_v38, %v989_v54  ;;  %v1437_v54 = vstv %s2726_s17  ;;  %s1583_s17 = scalar_lea.sflag [#allocation5], %s2125_s4 }
 0x231   : > { %1336 = vrot.lane.b32.xlu0 %v1332_v39, %s2004_s26  ;;  %1322 = vrot.lane.b32.xlu1 %v1318_v23, %s2005_s29  ;;  %v1425_v39 = vmul.f32 %v1423_v27, %v2710_v8  ;;  %v1439_v23 = vmul.f32 %v1437_v54, %v2710_v8 }
 0x232   : > { %1308 = vrot.lane.b32.xlu2 %v1304_v42, %s2003_s24  ;;  %v1011_v43 = vadd.f32 %v1007_v16, %v997_v41  ;;  %v1411_v41 = vmul.f32 %v1409_v26, %v2710_v8 }
 0x233   : > { %v1005_v44 = vpop.permute.xlu1 %1004  ;;  %v1019_v51 = vpop.permute.xlu0 %1018 }
 0x234   : > { %v1010_v45 = vadd.f32 %v1005_v44, %v996_v46  ;;  %v1049_v47 = vpop.permute.xlu2 %1048  ;;  %v1424_v46 = vmul.f32 %v1423_v27, %v2694_v59 }
 0x236   : > { %v1024_v48 = vadd.f32 %v1019_v51, %v1010_v45 }
 0x238   : > { %v1038_v55 = vadd.f32 %v1033_v35, %v1024_v48  ;;  %v1459_v48 = vstv %s2734_s19 }
 0x239   : > { %1352 = vrot.lane.b32.xlu0 %v1347_v50, %s2006_s3  ;;  %1338 = vrot.lane.b32.xlu1 %v1333_v3, %s2004_s26 }
 0x23a   : > { %1324 = vrot.lane.b32.xlu2 %v1319_v52, %s2005_s29 }
 0x23b   : > { %v1021_v56 = vpop.permute.xlu1 %1020  ;;  %v1035_v57 = vpop.permute.xlu0 %1034 }
 0x23c   : > { %v1025_v63 = vadd.f32 %v1021_v56, %v1011_v43  ;;  %v1075_v58 = vpop.permute.xlu2 %1074 }
 0x23e   : > { %v1039_v60 = vadd.f32 %v1035_v57, %v1025_v63 }
 0x240   : > { %v1053_v2 = vadd.f32 %v1049_v47, %v1039_v60  ;;  %v2745_v47 = vld [vmem:[#allocation2 + $0x1e] sm:$0xff]  ;;  %v1177_v60 = vstv %s2749_s30 }
 0x241   : > { %1386 = vrot.lane.b32.xlu0 %v1382_v62, %s2001_s14  ;;  %1372 = vrot.lane.b32.xlu1 %v1368_v0, %s2002_s16  ;;  %v1460_v3 = vmul.f32 %v1459_v48, %v2745_v47  ;;  %v1474_v52 = vmul.f32 %v1473_v30, %v2745_v47  ;;  %v1487_v0 = vstv %s2751_s27 }
 0x242   : > { %1350 = vrot.lane.b32.xlu2 %v1346_v1, %s2006_s3  ;;  %v1475_v1 = vmul.f32 %v1473_v30, %v2761_v9 }
 0x243   : > { %v1047_v4 = vpop.permute.xlu1 %1046  ;;  %v1061_v6 = vpop.permute.xlu0 %1060 }
 0x244   : > { %v1052_v12 = vadd.f32 %v1047_v4, %v1038_v55  ;;  %v1099_v5 = vpop.permute.xlu2 %1098  ;;  %v1438_v55 = vmul.f32 %v1437_v54, %v2694_v59 }
 0x246   : > { %v1066_v11 = vadd.f32 %v1061_v6, %v1052_v12  ;;  %v1461_v6 = vmul.f32 %v1459_v48, %v2761_v9  ;;  %v1178_v12 = vmul.f32 %v1177_v60, %v2592_v19 }
 0x248   : > { %v1080_v17 = vadd.f32 %v1075_v58, %v1066_v11 }
 0x249   : > { %1388 = vrot.lane.b32.xlu1 %v1383_v14, %s2001_s14  ;;  %1402 = vrot.lane.b32.xlu0 %v1397_v15, %s2003_s24  ;;  %v1501_v15 = vstv %s2759_s6  ;;  %s1943_s6 = scalar_lea.hbm %s2835_s2, 32 }
 0x24a   : > { %1374 = vrot.lane.b32.xlu2 %v1369_v18, %s2002_s16  ;;  %v1088_v16 = vadd.f32 %v1086_v49, %v1080_v17  ;;  %v1515_v17 = vstv %s2763_s7  ;;  %v1179_v18 = vmul.f32 %v1177_v60, %v2608_v29 }
 0x24b   : > { %v1063_v21 = vpop.permute.xlu1 %1062  ;;  %v1077_v22 = vpop.permute.xlu0 %1076  ;;  %v1516_v19 = vmul.f32 %v1515_v17, %v2745_v47 }
 0x24c   : > { %v1067_v24 = vadd.f32 %v1063_v21, %v1053_v2  ;;  %v1125_v25 = vpop.permute.xlu2 %1124  ;;  %v1489_v2 = vmul.f32 %v1487_v0, %v2761_v9 }
 0x24e   : > { %v1081_v31 = vadd.f32 %v1077_v22, %v1067_v24  ;;  %v1488_v22 = vmul.f32 %v1487_v0, %v2745_v47 }
 0x250   : > { %v1089_v32 = vadd.f32 %v1087_v53, %v1081_v31  ;;  %v1529_v31 = vstv %s1790_s8 }
 0x251   : > { %1414 = vrot.lane.b32.xlu1 %v1410_v28, %s2005_s29  ;;  %1428 = vrot.lane.b32.xlu0 %v1424_v46, %s2004_s26  ;;  %v1517_v28 = vmul.f32 %v1515_v17, %v2761_v9  ;;  %v1531_v46 = vmul.f32 %v1529_v31, %v2761_v9 }
 0x252   : > { %1400 = vrot.lane.b32.xlu2 %v1396_v33, %s2003_s24  ;;  %v1103_v34 = vadd.f32 %v1099_v5, %v1089_v32  ;;  %v1503_v32 = vmul.f32 %v1501_v15, %v2761_v9 }
 0x253   : > { %v1097_v35 = vpop.permute.xlu1 %1096  ;;  %v1111_v40 = vpop.permute.xlu0 %1110 }
 0x254   : > { %v1102_v36 = vadd.f32 %v1097_v35, %v1088_v16  ;;  %v1141_v37 = vpop.permute.xlu2 %1140  ;;  %v1502_v16 = vmul.f32 %v1501_v15, %v2745_v47 }
 0x256   : > { %v1116_v38 = vadd.f32 %v1111_v40, %v1102_v36 }
 0x258   : > { %v1130_v42 = vadd.f32 %v1125_v25, %v1116_v38  ;;  %v1530_v38 = vmul.f32 %v1529_v31, %v2745_v47 }
 0x259   : > { %1430 = vrot.lane.b32.xlu1 %v1425_v39, %s2004_s26  ;;  %1444 = vrot.lane.b32.xlu0 %v1439_v23, %s2006_s3 }
 0x25a   : > { %1416 = vrot.lane.b32.xlu2 %v1411_v41, %s2005_s29 }
 0x25b   : > { %v1113_v43 = vpop.permute.xlu1 %1112  ;;  %v1127_v44 = vpop.permute.xlu0 %1126 }
 0x25c   : > { %v1117_v51 = vadd.f32 %v1113_v43, %v1103_v34  ;;  %v1167_v45 = vpop.permute.xlu2 %1166 }
 0x25e   : > { %v1131_v50 = vadd.f32 %v1127_v44, %v1117_v51 }
 0x260   : > { %v1145_v56 = vadd.f32 %v1141_v37, %v1131_v50 }
 0x261   : > { %1464 = vrot.lane.b32.xlu1 %v1460_v3, %s2002_s16  ;;  %1478 = vrot.lane.b32.xlu0 %v1474_v52, %s2001_s14 }
 0x262   : > { %1442 = vrot.lane.b32.xlu2 %v1438_v55, %s2006_s3 }
 0x263   : > { %v1139_v57 = vpop.permute.xlu1 %1138  ;;  %v1153_v63 = vpop.permute.xlu0 %1152 }
 0x264   : > { %v1144_v58 = vadd.f32 %v1139_v57, %v1130_v42  ;;  %v1191_v61 = vpop.permute.xlu2 %1190 }
 0x266   : > { %v1158_v62 = vadd.f32 %v1153_v63, %v1144_v58 }
 0x268   : > { %v1172_v4 = vadd.f32 %v1167_v45, %v1158_v62 }
 0x269   : > { %1480 = vrot.lane.b32.xlu1 %v1475_v1, %s2001_s14  ;;  %1494 = vrot.lane.b32.xlu0 %v1489_v2, %s2003_s24  ;;  %s1770_s14 = sld [smem:[#allocation3 + $0x4d]] }
 0x26a   : > { %1466 = vrot.lane.b32.xlu2 %v1461_v6, %s2002_s16  ;;  %v1180_v5 = vadd.f32 %v1178_v12, %v1172_v4  ;;  %s1777_s16 = sld [smem:[#allocation3 + $0x54]] }
 0x26b   : > { %v1155_v10 = vpop.permute.xlu1 %1154  ;;  %v1169_v11 = vpop.permute.xlu0 %1168 }
 0x26c   : > { %v1159_v13 = vadd.f32 %v1155_v10, %v1145_v56  ;;  %v1217_v14 = vpop.permute.xlu2 %1216 }
 0x26e   : > { %v1173_v49 = vadd.f32 %v1169_v11, %v1159_v13 }
 0x26f   : > { %v1269_v43 = vstv %s1770_s14 }
 0x270   : > { %v1181_v21 = vadd.f32 %v1179_v18, %v1173_v49  ;;  %v1270_v45 = vmul.f32 %v1269_v43, %v2643_v7  ;;  %v1271_v55 = vmul.f32 %v1269_v43, %v2659_v20  ;;  %v1361_v13 = vstv %s1777_s16 }
 0x271   : > { %1506 = vrot.lane.b32.xlu1 %v1502_v16, %s2005_s29  ;;  %1520 = vrot.lane.b32.xlu0 %v1516_v19, %s2004_s26  ;;  %v1362_v17 = vmul.f32 %v1361_v13, %v2694_v59 }
 0x272   : > { %1492 = vrot.lane.b32.xlu2 %v1488_v22, %s2003_s24  ;;  %v1195_v24 = vadd.f32 %v1191_v61, %v1181_v21  ;;  %s1784_s24 = sld [smem:[#allocation3 + $0x5b]] }
 0x273   : > { %v1189_v25 = vpop.permute.xlu1 %1188  ;;  %v1203_v26 = vpop.permute.xlu0 %1202 }
 0x274   : > { %v1194_v27 = vadd.f32 %v1189_v25, %v1180_v5  ;;  %v1233_v29 = vpop.permute.xlu2 %1232 }
 0x276   : > { %v1208_v53 = vadd.f32 %v1203_v26, %v1194_v27 }
 0x278   : > { %v1222_v33 = vadd.f32 %v1217_v14, %v1208_v53 }
 0x279   : > { %1522 = vrot.lane.b32.xlu1 %v1517_v28, %s2004_s26  ;;  %1536 = vrot.lane.b32.xlu0 %v1531_v46, %s2006_s3  ;;  %s1693_s26 = sshll.u32 %s2125_s4, 4 }
 0x27a   : > { %1508 = vrot.lane.b32.xlu2 %v1503_v32, %s2005_s29  ;;  %s1797_s29 = sshll.u32 %s2045_s13, 4  ;;  %s177_s13 = scalar_lea.vmem [#allocation8], %s1693_s26 }
 0x27b   : > { %v1205_v34 = vpop.permute.xlu1 %1204  ;;  %v1219_v35 = vpop.permute.xlu0 %1218  ;;  %s1594_s23 = scalar_lea.hbm %s2835_s2, %s1797_s29  ;;  %s1595_s28 = sshll.u32 %s177_s13, 4  ;;  %s1596_s28 = int_to_ptr.vmem [resolvable:$true] %s1595_s28 }
 0x27c   : > { %v1209_v40 = vadd.f32 %v1205_v34, %v1195_v24  ;;  %v1259_v36 = vpop.permute.xlu2 %1258  ;;  %v1363_v24 = vmul.f32 %v1361_v13, %v2710_v8  ;;  %s1597_s5 = sshll.u32 %s1594_s23, 4  ;;  %s1598_s5 = int_to_ptr.hbm [resolvable:$true] %s1597_s5 }
 0x27d   : > { %s1937_s19 = sshra.s32 %s1598_s5, 4  ;;  %s1938_s19 = int_to_ptr.hbm [resolvable:$true] %s1937_s19 }
 0x27e   : > { %v1223_v37 = vadd.f32 %v1219_v35, %v1209_v40  ;;  %s1939_s25 = scalar_lea.hbm %s1938_s19, 16  ;;  %p1944_p0 = scmp.lt.s32.totalorder %s1938_s19, %s2835_s2 }
 0x27f   : > { %p1940_p4 = scmp.ne.s32.totalorder %s1938_s19, %s1939_s25  ;;  %p1945_p3 = scmp.lt.s32.totalorder %s1943_s6, %s1939_s25 }
 0x280   : > { %v1237_v54 = vadd.f32 %v1233_v29, %v1223_v37 }
 0x281   : > { %p1941_p6 = pnand %p1940_p4, %p2076_p11  ;;  %p1946_p5 = por %p1945_p3, %p1944_p0 }
 0x282   : > { %1534 = vrot.lane.b32.xlu2 %v1530_v38, %s2006_s3  ;;  %v1453_v38 = vstv %s1784_s24 }
 0x283   : > { %v1231_v39 = vpop.permute.xlu1 %1230  ;;  %v1245_v23 = vpop.permute.xlu0 %1244  ;;  %p1942_p13 = pneg %p1941_p6 }
 0x284   : > { %v1236_v41 = vadd.f32 %v1231_v39, %v1222_v33  ;;  %v1283_v42 = vpop.permute.xlu2 %1282 }
 0x285   : > { %p1947_p8 = pnand %p1946_p5, %p1942_p13 }
 0x286   : > { %v1250_v44 = vadd.f32 %v1245_v23, %v1236_v41  ;;  %v1454_v41 = vmul.f32 %v1453_v38, %v2745_v47 }
 0x288   : > { %v1264_v51 = vadd.f32 %v1259_v36, %v1250_v44 }
 0x28a   : > { %v1272_v48 = vadd.f32 %v1270_v45, %v1264_v51 }
 0x28b   : > { %v1247_v30 = vpop.permute.xlu1 %1246  ;;  %v1261_v50 = vpop.permute.xlu0 %1260 }
 0x28c   : > { %v1251_v3 = vadd.f32 %v1247_v30, %v1237_v54  ;;  %v1309_v52 = vpop.permute.xlu2 %1308 }
 0x28e   : > { %v1265_v56 = vadd.f32 %v1261_v50, %v1251_v3 }
 0x290   : > { %v1273_v57 = vadd.f32 %v1271_v55, %v1265_v56 }
 0x292   : > { %v1287_v4 = vadd.f32 %v1283_v42, %v1273_v57 }
 0x293   : > { %v1281_v63 = vpop.permute.xlu1 %1280  ;;  %v1295_v58 = vpop.permute.xlu0 %1294 }
 0x294   : > { %v1325_v61 = vpop.permute.xlu2 %1324  ;;  %v1286_v60 = vadd.f32 %v1281_v63, %v1272_v48  ;;  %v1455_v48 = vmul.f32 %v1453_v38, %v2761_v9 }
 0x296   : > { %v1300_v2 = vadd.f32 %v1295_v58, %v1286_v60 }
 0x298   : > { %v1314_v6 = vadd.f32 %v1309_v52, %v1300_v2 }
 0x29b   : > { %v1297_v62 = vpop.permute.xlu1 %1296  ;;  %v1311_v0 = vpop.permute.xlu0 %1310 }
 0x29c   : > { %v1351_v1 = vpop.permute.xlu2 %1350  ;;  %v1301_v7 = vadd.f32 %v1297_v62, %v1287_v4 }
 0x29e   : > { %v1315_v20 = vadd.f32 %v1311_v0, %v1301_v7 }
 0x2a0   : > { %v1329_v18 = vadd.f32 %v1325_v61, %v1315_v20 }
 0x2a3   : > { %v1323_v12 = vpop.permute.xlu1 %1322  ;;  %v1337_v5 = vpop.permute.xlu0 %1336 }
 0x2a4   : > { %v1328_v10 = vadd.f32 %v1323_v12, %v1314_v6  ;;  %v1375_v11 = vpop.permute.xlu2 %1374 }
 0x2a6   : > { %v1342_v14 = vadd.f32 %v1337_v5, %v1328_v10 }
 0x2a8   : > { %v1356_v15 = vadd.f32 %v1351_v1, %v1342_v14 }
 0x2aa   : > { %v1364_v49 = vadd.f32 %v1362_v17, %v1356_v15 }
 0x2ab   : > { %v1339_v16 = vpop.permute.xlu1 %1338  ;;  %v1353_v19 = vpop.permute.xlu0 %1352 }
 0x2ac   : > { %v1343_v21 = vadd.f32 %v1339_v16, %v1329_v18  ;;  %v1401_v22 = vpop.permute.xlu2 %1400 }
 0x2ae   : > { %v1357_v25 = vadd.f32 %v1353_v19, %v1343_v21 }
 0x2b0   : > { %v1365_v26 = vadd.f32 %v1363_v24, %v1357_v25 }
 0x2b2   : > { %v1379_v59 = vadd.f32 %v1375_v11, %v1365_v26 }
 0x2b3   : > { %v1373_v27 = vpop.permute.xlu1 %1372  ;;  %v1387_v29 = vpop.permute.xlu0 %1386 }
 0x2b4   : > { %v1417_v53 = vpop.permute.xlu2 %1416  ;;  %v1378_v31 = vadd.f32 %v1373_v27, %v1364_v49 }
 0x2b6   : > { %v1392_v32 = vadd.f32 %v1387_v29, %v1378_v31 }
 0x2b8   : > { %v1406_v35 = vadd.f32 %v1401_v22, %v1392_v32 }
 0x2bb   : > { %v1389_v28 = vpop.permute.xlu1 %1388  ;;  %v1403_v46 = vpop.permute.xlu0 %1402 }
 0x2bc   : > { %v1443_v33 = vpop.permute.xlu2 %1442  ;;  %v1393_v34 = vadd.f32 %v1389_v28, %v1379_v59 }
 0x2be   : > { %v1407_v54 = vadd.f32 %v1403_v46, %v1393_v34 }
 0x2c0   : > { %v1421_v42 = vadd.f32 %v1417_v53, %v1407_v54 }
 0x2c3   : > { %v1415_v40 = vpop.permute.xlu1 %1414  ;;  %v1429_v36 = vpop.permute.xlu0 %1428 }
 0x2c4   : > { %v1420_v37 = vadd.f32 %v1415_v40, %v1406_v35  ;;  %v1467_v39 = vpop.permute.xlu2 %1466 }
 0x2c6   : > { %v1434_v8 = vadd.f32 %v1429_v36, %v1420_v37 }
 0x2c8   : > { %v1448_v23 = vadd.f32 %v1443_v33, %v1434_v8 }
 0x2ca   : > { %v1456_v43 = vadd.f32 %v1454_v41, %v1448_v23 }
 0x2cb   : > { %v1431_v44 = vpop.permute.xlu1 %1430  ;;  %v1445_v51 = vpop.permute.xlu0 %1444 }
 0x2cc   : > { %v1435_v45 = vadd.f32 %v1431_v44, %v1421_v42  ;;  %v1493_v3 = vpop.permute.xlu2 %1492 }
 0x2ce   : > { %v1449_v30 = vadd.f32 %v1445_v51, %v1435_v45 }
 0x2d0   : > { %v1457_v50 = vadd.f32 %v1455_v48, %v1449_v30 }
 0x2d2   : > { %v1471_v60 = vadd.f32 %v1467_v39, %v1457_v50 }
 0x2d3   : > { %v1465_v52 = vpop.permute.xlu1 %1464  ;;  %v1479_v55 = vpop.permute.xlu0 %1478 }
 0x2d4   : > { %v1470_v56 = vadd.f32 %v1465_v52, %v1456_v43  ;;  %v1509_v58 = vpop.permute.xlu2 %1508 }
 0x2d6   : > { %v1484_v61 = vadd.f32 %v1479_v55, %v1470_v56 }
 0x2d8   : > { %v1498_v47 = vadd.f32 %v1493_v3, %v1484_v61 }
 0x2db   : > { %v1481_v57 = vpop.permute.xlu1 %1480  ;;  %v1495_v63 = vpop.permute.xlu0 %1494 }
 0x2dc   : > { %v1485_v62 = vadd.f32 %v1481_v57, %v1471_v60  ;;  %v1535_v6 = vpop.permute.xlu2 %1534 }
 0x2de   : > { %v1499_v4 = vadd.f32 %v1495_v63, %v1485_v62 }
 0x2e0   : > { %v1513_v5 = vadd.f32 %v1509_v58, %v1499_v4 }
 0x2e3   : > { %v1507_v0 = vpop.permute.xlu1 %1506  ;;  %v1521_v1 = vpop.permute.xlu0 %1520 }
 0x2e4   : > { %v1512_v2 = vadd.f32 %v1507_v0, %v1498_v47 }
 0x2e6   : > { %v1526_v7 = vadd.f32 %v1521_v1, %v1512_v2 }
 0x2e8   : > { %v1540_v9 = vadd.f32 %v1535_v6, %v1526_v7 }
 0x2ea   : > { %v1542_v12 = vsub.f32 0.0, %v1540_v9 }
 0x2eb   : > { %v1523_v10 = vpop.permute.xlu1 %1522  ;;  %v1537_v20 = vpop.permute.xlu0 %1536 }
 0x2ec   : > { %v1544_v11 = vmul.f32 1.442695, %v1542_v12  ;;  %v1527_v13 = vadd.f32 %v1523_v10, %v1513_v5 }
 0x2ee   : > { %1870 = vpow2.f32 %v1544_v11  ;;  %v1541_v14 = vadd.f32 %v1537_v20, %v1527_v13 }
 0x2f0   : > { %v1543_v15 = vsub.f32 0.0, %v1541_v14 }
 0x2f2   : > { %v1546_v17 = vmul.f32 1.442695, %v1543_v15 }
 0x2f4   : > { %v1871_v18 = vpop.eup %1870  ;;  %1872 = vpow2.f32 %v1546_v17 }
 0x2f5   : > { %v1548_v49 = vadd.f32 1.0, %v1871_v18 }
 0x2f7   : > { %1874 = vrcp.f32 %v1548_v49  ;;  %v1561_v25 = vand.u32 2147483648, %v1548_v49  ;;  %v1559_v27 = vand.u32 2147483647, %v1548_v49  ;;  %vm1555_vm6 = vweird.f32 %v1548_v49 }
 0x2f9   : > { %v1562_v28 = vor.u32 1.1754944e-38, %v1561_v25  ;;  %vm1560_vm8 = vcmp.eq.f32.partialorder %v1559_v27, 8.507059e+37 }
 0x2fa   : > { %v1873_v16 = vpop.eup %1872 }
 0x2fb   : > { %v1549_v19 = vadd.f32 1.0, %v1873_v16 }
 0x2fd   : > { %v1875_v21 = vpop.eup %1874  ;;  %1876 = vrcp.f32 %v1549_v19  ;;  %v1576_v33 = vand.u32 2147483648, %v1549_v19  ;;  %v1574_v35 = vand.u32 2147483647, %v1549_v19  ;;  %vm1570_vm10 = vweird.f32 %v1549_v19 }
 0x2fe   : > { %v1551_v22 = vmul.f32 %v1875_v21, %v1548_v49  ;;  %vm1556_vm5 = vweird.f32 %v1875_v21 }
 0x2ff   : > { %vm1557_vm7 = vmor %vm1555_vm6, %vm1556_vm5  ;;  %v1577_v36 = vor.u32 1.1754944e-38, %v1576_v33  ;;  %vm1575_vm12 = vcmp.eq.f32.partialorder %v1574_v35, 8.507059e+37 }
 0x300   : > { %v1552_v24 = vsub.f32 1.0, %v1551_v22 }
 0x302   : > { %v1553_v26 = vmul.f32 %v1875_v21, %v1552_v24 }
 0x303   : > { %v1877_v29 = vpop.eup %1876 }
 0x304   : > { %v1566_v53 = vmul.f32 %v1877_v29, %v1549_v19  ;;  %v1554_v31 = vadd.f32 %v1875_v21, %v1553_v26  ;;  %vm1571_vm9 = vweird.f32 %v1877_v29 }
 0x305   : > { %vm1572_vm11 = vmor %vm1570_vm10, %vm1571_vm9 }
 0x306   : > { %v1567_v46 = vsub.f32 1.0, %v1566_v53  ;;  %v1558_v32 = vsel %vm1557_vm7, %v1875_v21, %v1554_v31 }
 0x307   : > { %v1563_v59 = vsel %vm1560_vm8, %v1562_v28, %v1558_v32 }
 0x308   : > { %v1568_v34 = vmul.f32 %v1877_v29, %v1567_v46  ;;  %1580 = vst.msk [vmem:[%s177_s13] sm:$0xff] %vm186_vm0, %v1563_v59 }
 0x30a   : > { %v1569_v40 = vadd.f32 %v1877_v29, %v1568_v34 }
 0x30c   : > { %v1573_v37 = vsel %vm1572_vm11, %v1877_v29, %v1569_v40 }
 0x30d   : > { %v1578_v38 = vsel %vm1575_vm12, %v1577_v36, %v1573_v37 }
 0x30e   : > { %1581 = vst.msk [vmem:[%s177_s13 + $0x8] sm:$0xff] %vm186_vm0, %v1578_v38 }
 0x30f   : > { %1950 = shalt.err (!%p1947_p8)
}
 0x310   : > { %s2007_s4 = smov 128   ;;  %s2008_s14 = smov 8  }
 0x311   : > { %1804 = dma.vmem_to_hbm [thread:$0]  (%p2076_p11), %s1596_s28, 256, %s1598_s5, %s1583_s17, %s2007_s4, %s2007_s4, %s2008_s14  }
 0x312 PF: > { %s1612_s16 = sand.u32 1, %s1981_s9   ;;  %p2842_p9 = scmp.ge.s32.totalorder %s1993_s12, 2 }
 0x313   : > { %s1613_s24 = scalar_lea.sflag [#allocation5], %s1612_s16 }
 0x314   : > { %p1815_p10 = pnand %p2842_p9, %p2080_p12 }
 0x316   : > { %p1816_p1 = pneg %p1815_p10 }
 0x318   : > { %1976 = dma.done.wait (%p1816_p1), %s1613_s24, 256  }
 0x319   : > { %1978 = vsyncadd (%p1816_p1), %s1613_s24, 4294967040  ;;  %p16_p2 = scmp.ge.s32.totalorder %s2049_s15, 4   ;;  %s2843_s9 = smov %s1985_s10 }
 0x31a   : > { %s2844_s10 = smov %s1989_s11  ;;  %s2845_s11 = smov %s2061_s18 }
 0x31b   : > { %s2846_s12 = smov %s2049_s15  ;;  %18 = sbr.rel (!%p16_p2) target bundleno = 6 (0x6), region = 79 }
 0x320   :  { %1619 = vsyncpa [#allocation4], 1 }
 0x321   :  { %1621 = vsyncpa [#allocation4 + $0x1], 1 }
 0x322   :  { %1622 = vsyncpa [#allocation5], 1 }
 0x323   :  { %1624 = vsyncpa [#allocation5 + $0x1], 1 }
 0x324   :  { %1625 = vsyncpa [#allocation6], 1 }
 0x325   :  { %1627 = vsyncpa [#allocation6 + $0x1], 1 }

</bundles_post_ra>
